<compile_context>
chip_gen: v7x
topology: tpu7x:2x2x1
jax: 0.10.0
libtpu: 0.0.40
codegen_flags: <defaults>
</compile_context>

<pallas_src>
import functools
import math

import jax
import jax.numpy as jnp
from jax.experimental import pallas as pl
from jax.experimental.pallas import tpu as pltpu


# ----------------------------------------------------------------------------
# In-kernel building blocks (operate on VMEM-resident values)
# ----------------------------------------------------------------------------

def _layernorm(x, g, b, eps=1e-5):
    mean = jnp.mean(x, axis=-1, keepdims=True)
    var = jnp.mean(jnp.square(x - mean), axis=-1, keepdims=True)
    return (x - mean) * jax.lax.rsqrt(var + eps) * g + b


def _add_layernorm(x, res, g, b):
    # residual add fused with the LayerNorm (no extra HBM round-trip)
    return _layernorm(x + res, g, b)


def _ffn_relu(x, w1, b1, w2, b2):
    h = jnp.maximum(jnp.dot(x, w1, preferred_element_type=jnp.float32) + b1, 0.0)
    return jnp.dot(h, w2, preferred_element_type=jnp.float32) + b2


def _mha(x_q, x_kv, in_w, in_b, out_w, out_b, N, H):
    """torch.nn.MultiheadAttention forward (no masks, dropout=identity).

    x_q : (N*Tq, E) batch-major rows; x_kv : (N*Tk, E)
    in_w: (E, 3E)  in_b: (1, 3E)  out_w: (E, E)  out_b: (1, E)
    """
    E = x_q.shape[-1]
    Dh = E // H
    Tq = x_q.shape[0] // N
    Tk = x_kv.shape[0] // N
    scaling = float(Dh) ** -0.5

    if x_q is x_kv:
        # self-attention: single fused QKV matmul
        qkv = jnp.dot(x_q, in_w, preferred_element_type=jnp.float32) + in_b
        q = qkv[:, :E]
        k = qkv[:, E:2 * E]
        v = qkv[:, 2 * E:]
    else:
        # cross-attention: Q from x_q, fused KV matmul from x_kv
        q = jnp.dot(x_q, in_w[:, :E], preferred_element_type=jnp.float32) + in_b[:, :E]
        kv = jnp.dot(x_kv, in_w[:, E:], preferred_element_type=jnp.float32) + in_b[:, E:]
        k = kv[:, :E]
        v = kv[:, E:]
    q = q * scaling

    # Head-batched (N*H, T, Dh) slabs via static slices (stay in VMEM).
    qh = jnp.stack([q[n * Tq:(n + 1) * Tq, h * Dh:(h + 1) * Dh]
                    for n in range(N) for h in range(H)])
    kh = jnp.stack([k[n * Tk:(n + 1) * Tk, h * Dh:(h + 1) * Dh]
                    for n in range(N) for h in range(H)])
    vh = jnp.stack([v[n * Tk:(n + 1) * Tk, h * Dh:(h + 1) * Dh]
                    for n in range(N) for h in range(H)])

    # Batched scores; contraction on the last dims (no materialized transpose).
    s = jax.lax.dot_general(qh, kh, (((2,), (2,)), ((0,), (0,))),
                            preferred_element_type=jnp.float32)        # (NH,Tq,Tk)
    s = s - jnp.max(s, axis=-1, keepdims=True)
    p = jnp.exp(s)
    p = p * pl.reciprocal(jnp.sum(p, axis=-1, keepdims=True), approx=True)
    o = jax.lax.dot_general(p, vh, (((2,), (1,)), ((0,), (0,))),
                            preferred_element_type=jnp.float32)        # (NH,Tq,Dh)

    # Output projection fused with the head merge: head h multiplies rows
    # [h*Dh:(h+1)*Dh] of out_w, so accumulate per-head contributions instead of
    # concatenating along the lane dim.
    rows = []
    for n in range(N):
        acc = None
        for h in range(H):
            c = jnp.dot(o[n * H + h], out_w[h * Dh:(h + 1) * Dh, :],
                        preferred_element_type=jnp.float32)
            acc = c if acc is None else acc + c
        rows.append(acc)
    return jnp.concatenate(rows, axis=0) + out_b                       # (N*Tq, E)


# ----------------------------------------------------------------------------
# Fused encoder / decoder stack kernels (grid over layers)
# ----------------------------------------------------------------------------

def _encoder_stack_kernel(src_ref,
                          in_w, in_b, out_w, out_b,
                          w1, b1, w2, b2,
                          n1g, n1b, n2g, n2b,
                          fng, fnb,
                          o_ref, *, N, H):
    l = pl.program_id(0)

    @pl.when(l == 0)
    def _():
        o_ref[...] = src_ref[...]

    x = o_ref[...]
    attn = _mha(x, x, in_w[0], in_b[0], out_w[0], out_b[0], N, H)
    x = _add_layernorm(x, attn, n1g[0], n1b[0])
    ff = _ffn_relu(x, w1[0], b1[0], w2[0], b2[0])
    x = _add_layernorm(x, ff, n2g[0], n2b[0])
    o_ref[...] = x

    @pl.when(l == pl.num_programs(0) - 1)
    def _():
        # final TransformerEncoder norm, fused into the last grid step
        o_ref[...] = _layernorm(o_ref[...], fng[...], fnb[...])


def _decoder_stack_kernel(tgt_ref, mem_ref,
                          sa_in_w, sa_in_b, sa_out_w, sa_out_b,
                          ca_in_w, ca_in_b, ca_out_w, ca_out_b,
                          w1, b1, w2, b2,
                          n1g, n1b, n2g, n2b, n3g, n3b,
                          fng, fnb,
                          o_ref, *, N, H):
    l = pl.program_id(0)

    @pl.when(l == 0)
    def _():
        o_ref[...] = tgt_ref[...]

    x = o_ref[...]
    mem = mem_ref[...]
    sa = _mha(x, x, sa_in_w[0], sa_in_b[0], sa_out_w[0], sa_out_b[0], N, H)
    x = _add_layernorm(x, sa, n1g[0], n1b[0])
    ca = _mha(x, mem, ca_in_w[0], ca_in_b[0], ca_out_w[0], ca_out_b[0], N, H)
    x = _add_layernorm(x, ca, n2g[0], n2b[0])
    ff = _ffn_relu(x, w1[0], b1[0], w2[0], b2[0])
    x = _add_layernorm(x, ff, n3g[0], n3b[0])
    o_ref[...] = x

    @pl.when(l == pl.num_programs(0) - 1)
    def _():
        # final TransformerDecoder norm, fused into the last grid step
        o_ref[...] = _layernorm(o_ref[...], fng[...], fnb[...])


# ----------------------------------------------------------------------------
# Wrappers: stack per-layer weights and launch ONE pallas_call per stack
# ----------------------------------------------------------------------------

def _w3(d0, d1):
    return pl.BlockSpec((1, d0, d1), lambda l: (l, 0, 0))


def _full2(d0, d1):
    return pl.BlockSpec((d0, d1), lambda l: (0, 0))


def encoder_stack_forward(src2d, layers, final_norm, N, H):
    L = len(layers)
    E = src2d.shape[-1]
    F = layers[0]["lin1"][0].shape[1]
    M = src2d.shape[0]

    def st(f):
        return jnp.stack([f(p) for p in layers])

    args = (
        src2d,
        st(lambda p: p["self_attn"]["in_w"]),
        st(lambda p: p["self_attn"]["in_b"].reshape(1, 3 * E)),
        st(lambda p: p["self_attn"]["out_w"]),
        st(lambda p: p["self_attn"]["out_b"].reshape(1, E)),
        st(lambda p: p["lin1"][0]), st(lambda p: p["lin1"][1].reshape(1, F)),
        st(lambda p: p["lin2"][0]), st(lambda p: p["lin2"][1].reshape(1, E)),
        st(lambda p: p["norm1"][0].reshape(1, E)),
        st(lambda p: p["norm1"][1].reshape(1, E)),
        st(lambda p: p["norm2"][0].reshape(1, E)),
        st(lambda p: p["norm2"][1].reshape(1, E)),
        final_norm[0].reshape(1, E), final_norm[1].reshape(1, E),
    )

    in_specs = [
        _full2(M, E),
        _w3(E, 3 * E), _w3(1, 3 * E), _w3(E, E), _w3(1, E),
        _w3(E, F), _w3(1, F), _w3(F, E), _w3(1, E),
        _w3(1, E), _w3(1, E), _w3(1, E), _w3(1, E),
        _full2(1, E), _full2(1, E),
    ]

    return pl.pallas_call(
        functools.partial(_encoder_stack_kernel, N=N, H=H),
        out_shape=jax.ShapeDtypeStruct((M, E), jnp.float32),
        grid=(L,),
        in_specs=in_specs,
        out_specs=_full2(M, E),
        compiler_params=pltpu.CompilerParams(dimension_semantics=("arbitrary",)),
    )(*args)


def decoder_stack_forward(tgt2d, mem2d, layers, final_norm, N, H):
    L = len(layers)
    E = tgt2d.shape[-1]
    F = layers[0]["lin1"][0].shape[1]
    M = tgt2d.shape[0]
    Ms = mem2d.shape[0]

    def st(f):
        return jnp.stack([f(p) for p in layers])

    args = (
        tgt2d, mem2d,
        st(lambda p: p["self_attn"]["in_w"]),
        st(lambda p: p["self_attn"]["in_b"].reshape(1, 3 * E)),
        st(lambda p: p["self_attn"]["out_w"]),
        st(lambda p: p["self_attn"]["out_b"].reshape(1, E)),
        st(lambda p: p["cross_attn"]["in_w"]),
        st(lambda p: p["cross_attn"]["in_b"].reshape(1, 3 * E)),
        st(lambda p: p["cross_attn"]["out_w"]),
        st(lambda p: p["cross_attn"]["out_b"].reshape(1, E)),
        st(lambda p: p["lin1"][0]), st(lambda p: p["lin1"][1].reshape(1, F)),
        st(lambda p: p["lin2"][0]), st(lambda p: p["lin2"][1].reshape(1, E)),
        st(lambda p: p["norm1"][0].reshape(1, E)),
        st(lambda p: p["norm1"][1].reshape(1, E)),
        st(lambda p: p["norm2"][0].reshape(1, E)),
        st(lambda p: p["norm2"][1].reshape(1, E)),
        st(lambda p: p["norm3"][0].reshape(1, E)),
        st(lambda p: p["norm3"][1].reshape(1, E)),
        final_norm[0].reshape(1, E), final_norm[1].reshape(1, E),
    )

    in_specs = [
        _full2(M, E), _full2(Ms, E),
        _w3(E, 3 * E), _w3(1, 3 * E), _w3(E, E), _w3(1, E),
        _w3(E, 3 * E), _w3(1, 3 * E), _w3(E, E), _w3(1, E),
        _w3(E, F), _w3(1, F), _w3(F, E), _w3(1, E),
        _w3(1, E), _w3(1, E), _w3(1, E), _w3(1, E), _w3(1, E), _w3(1, E),
        _full2(1, E), _full2(1, E),
    ]

    return pl.pallas_call(
        functools.partial(_decoder_stack_kernel, N=N, H=H),
        out_shape=jax.ShapeDtypeStruct((M, E), jnp.float32),
        grid=(L,),
        in_specs=in_specs,
        out_specs=_full2(M, E),
        compiler_params=pltpu.CompilerParams(dimension_semantics=("arbitrary",)),
    )(*args)


def transformer_forward(src, tgt, params, num_heads):
    """Transformer.forward(src, tgt) with all masks None (eval mode)."""
    if src.shape[1] != tgt.shape[1]:
        raise RuntimeError("the batch number of src and tgt must be equal")
    if src.shape[2] != params["dim_model"] or tgt.shape[2] != params["dim_model"]:
        raise RuntimeError("the feature number of src and tgt must be equal to d_model")

    S, N, E = src.shape
    T = tgt.shape[0]
    H = num_heads

    # Only XLA layout work in the whole model: (T,N,E) <-> batch-major (N*T,E)
    src2d = jnp.transpose(src, (1, 0, 2)).reshape(N * S, E)
    tgt2d = jnp.transpose(tgt, (1, 0, 2)).reshape(N * T, E)

    memory2d = encoder_stack_forward(src2d, params["encoder_layers"],
                                     params["encoder_norm"], N, H)
    out2d = decoder_stack_forward(tgt2d, memory2d, params["decoder_layers"],
                                  params["decoder_norm"], N, H)
    return jnp.transpose(out2d.reshape(N, T, E), (1, 0, 2))


# ----------------------------------------------------------------------------
# Deterministic parameter initialization (xavier-uniform for matrices)
# ----------------------------------------------------------------------------

def _xavier(key, shape):
    fan_in, fan_out = shape
    limit = math.sqrt(6.0 / (fan_in + fan_out))
    return jax.random.uniform(key, shape, minval=-limit, maxval=limit,
                              dtype=jnp.float32)


def init_mha(key, E):
    k1, k2 = jax.random.split(key)
    return {
        "in_w": _xavier(k1, (E, 3 * E)),        # stored (in, out) for x @ w
        "in_b": jnp.zeros((3 * E,), jnp.float32),
        "out_w": _xavier(k2, (E, E)),
        "out_b": jnp.zeros((E,), jnp.float32),
    }


def init_linear(key, d_in, d_out):
    return _xavier(key, (d_in, d_out)), jnp.zeros((d_out,), jnp.float32)


def init_layernorm(E):
    return jnp.ones((E,), jnp.float32), jnp.zeros((E,), jnp.float32)


def init_encoder_layer(key, E, F):
    k1, k2, k3 = jax.random.split(key, 3)
    return {
        "self_attn": init_mha(k1, E),
        "lin1": init_linear(k2, E, F),
        "lin2": init_linear(k3, F, E),
        "norm1": init_layernorm(E),
        "norm2": init_layernorm(E),
    }


def init_decoder_layer(key, E, F):
    k1, k2, k3, k4 = jax.random.split(key, 4)
    return {
        "self_attn": init_mha(k1, E),
        "cross_attn": init_mha(k2, E),
        "lin1": init_linear(k3, E, F),
        "lin2": init_linear(k4, F, E),
        "norm1": init_layernorm(E),
        "norm2": init_layernorm(E),
        "norm3": init_layernorm(E),
    }


def init_transformer(key, dim_model, dim_feedforward, n_enc, n_dec):
    keys = jax.random.split(key, n_enc + n_dec)
    return {
        "dim_model": dim_model,
        "encoder_layers": [init_encoder_layer(keys[i], dim_model, dim_feedforward)
                           for i in range(n_enc)],
        "decoder_layers": [init_decoder_layer(keys[n_enc + i], dim_model, dim_feedforward)
                           for i in range(n_dec)],
        "encoder_norm": init_layernorm(dim_model),
        "decoder_norm": init_layernorm(dim_model),
    }


# ----------------------------------------------------------------------------
# Main
# ----------------------------------------------------------------------------

if __name__ == "__main__":
    dim_model = 32
    num_heads = 4
    num_encoder_layers = 2
    num_decoder_layers = 2
    dim_feedforward = 64
    S, T, N = 8, 16, 2          # src len, tgt len, batch

    root = jax.random.PRNGKey(0)
    k_param, k_src, k_tgt = jax.random.split(root, 3)

    params = init_transformer(k_param, dim_model, dim_feedforward,
                              num_encoder_layers, num_decoder_layers)

    src = jax.random.normal(k_src, (S, N, dim_model), dtype=jnp.float32)
    tgt = jax.random.normal(k_tgt, (T, N, dim_model), dtype=jnp.float32)

    # TODO(synk): attn/key-padding masks and training-mode dropout are not
    # implemented (reference call here uses all-None masks, eval semantics).
    out = transformer_forward(src, tgt, params, num_heads)
    out = jax.block_until_ready(out)

    assert out.shape == (T, N, dim_model)
    assert bool(jnp.all(jnp.isfinite(out)))
    print("KERNEL_OK")
</pallas_src>

<mosaic_0001>
module attributes {stable_mosaic.version = 11 : i64} {
  func.func @_encoder_stack_kernel(%arg0: i32, %arg1: memref<16x32xf32, #tpu.memory_space<vmem>>, %arg2: memref<1x32x96xf32, #tpu.memory_space<vmem>>, %arg3: memref<1x1x96xf32, #tpu.memory_space<vmem>>, %arg4: memref<1x32x32xf32, #tpu.memory_space<vmem>>, %arg5: memref<1x1x32xf32, #tpu.memory_space<vmem>>, %arg6: memref<1x32x64xf32, #tpu.memory_space<vmem>>, %arg7: memref<1x1x64xf32, #tpu.memory_space<vmem>>, %arg8: memref<1x64x32xf32, #tpu.memory_space<vmem>>, %arg9: memref<1x1x32xf32, #tpu.memory_space<vmem>>, %arg10: memref<1x1x32xf32, #tpu.memory_space<vmem>>, %arg11: memref<1x1x32xf32, #tpu.memory_space<vmem>>, %arg12: memref<1x1x32xf32, #tpu.memory_space<vmem>>, %arg13: memref<1x1x32xf32, #tpu.memory_space<vmem>>, %arg14: memref<1x32xf32, #tpu.memory_space<vmem>>, %arg15: memref<1x32xf32, #tpu.memory_space<vmem>>, %arg16: memref<16x32xf32, #tpu.memory_space<vmem>>) attributes {dimension_semantics = [#tpu.dimension_semantics<arbitrary>], iteration_bounds = array<i64: 2>, scalar_prefetch = 0 : i64, scratch_operands = 0 : i64, tpu.core_type = #tpu.core_type<tc>, window_params = [{pipeline_mode = #tpu.pipeline_mode<synchronous>, transform_indices = @transform_0, window_bounds = array<i64: 16, 32>}, {transform_indices = @transform_1, window_bounds = array<i64: 1, 32, 96>}, {transform_indices = @transform_2, window_bounds = array<i64: 1, 1, 96>}, {transform_indices = @transform_3, window_bounds = array<i64: 1, 32, 32>}, {transform_indices = @transform_4, window_bounds = array<i64: 1, 1, 32>}, {transform_indices = @transform_5, window_bounds = array<i64: 1, 32, 64>}, {transform_indices = @transform_6, window_bounds = array<i64: 1, 1, 64>}, {transform_indices = @transform_7, window_bounds = array<i64: 1, 64, 32>}, {transform_indices = @transform_8, window_bounds = array<i64: 1, 1, 32>}, {transform_indices = @transform_9, window_bounds = array<i64: 1, 1, 32>}, {transform_indices = @transform_10, window_bounds = array<i64: 1, 1, 32>}, {transform_indices = @transform_11, window_bounds = array<i64: 1, 1, 32>}, {transform_indices = @transform_12, window_bounds = array<i64: 1, 1, 32>}, {pipeline_mode = #tpu.pipeline_mode<synchronous>, transform_indices = @transform_13, window_bounds = array<i64: 1, 32>}, {pipeline_mode = #tpu.pipeline_mode<synchronous>, transform_indices = @transform_14, window_bounds = array<i64: 1, 32>}, {pipeline_mode = #tpu.pipeline_mode<synchronous>, transform_indices = @transform_15, window_bounds = array<i64: 16, 32>}]} {
    %c0_i32 = arith.constant 0 : i32
    %0 = arith.cmpi eq, %arg0, %c0_i32 : i32
    %1 = arith.extui %0 : i1 to i32
    %c0_i32_0 = arith.constant 0 : i32
    %2 = arith.cmpi ne, %1, %c0_i32_0 : i32
    scf.if %2 {
      %c0_67 = arith.constant 0 : index
      %c0_68 = arith.constant 0 : index
      %198 = vector.load %arg1[%c0_67, %c0_68] : memref<16x32xf32, #tpu.memory_space<vmem>>, vector<16x32xf32>
      %c0_69 = arith.constant 0 : index
      %c0_70 = arith.constant 0 : index
      %199 = vector.load %arg16[%c0_69, %c0_70] : memref<16x32xf32, #tpu.memory_space<vmem>>, vector<16x32xf32>
      tpu.vector_store %arg16[%c0_69, %c0_70], %198 {strides = array<i32>} : memref<16x32xf32, #tpu.memory_space<vmem>>, vector<16x32xf32>,
    } else {
    }
    %c0 = arith.constant 0 : index
    %c0_1 = arith.constant 0 : index
    %3 = vector.load %arg16[%c0, %c0_1] : memref<16x32xf32, #tpu.memory_space<vmem>>, vector<16x32xf32>
    %c0_2 = arith.constant 0 : index
    %c0_3 = arith.constant 0 : index
    %c0_4 = arith.constant 0 : index
    %4 = vector.load %arg2[%c0_2, %c0_3, %c0_4] : memref<1x32x96xf32, #tpu.memory_space<vmem>>, vector<1x32x96xf32>
    %5 = vector.shape_cast %4 : vector<1x32x96xf32> to vector<32x96xf32>
    %c0_5 = arith.constant 0 : index
    %c0_6 = arith.constant 0 : index
    %c0_7 = arith.constant 0 : index
    %6 = vector.load %arg3[%c0_5, %c0_6, %c0_7] : memref<1x1x96xf32, #tpu.memory_space<vmem>>, vector<1x1x96xf32>
    %7 = vector.shape_cast %6 : vector<1x1x96xf32> to vector<1x96xf32>
    %c0_8 = arith.constant 0 : index
    %c0_9 = arith.constant 0 : index
    %c0_10 = arith.constant 0 : index
    %8 = vector.load %arg4[%c0_8, %c0_9, %c0_10] : memref<1x32x32xf32, #tpu.memory_space<vmem>>, vector<1x32x32xf32>
    %9 = vector.shape_cast %8 : vector<1x32x32xf32> to vector<32x32xf32>
    %c0_11 = arith.constant 0 : index
    %c0_12 = arith.constant 0 : index
    %c0_13 = arith.constant 0 : index
    %10 = vector.load %arg5[%c0_11, %c0_12, %c0_13] : memref<1x1x32xf32, #tpu.memory_space<vmem>>, vector<1x1x32xf32>
    %11 = vector.shape_cast %10 : vector<1x1x32xf32> to vector<1x32xf32>
    %cst = arith.constant dense<0.000000e+00> : vector<16x96xf32>
    %12 = tpu.matmul %3, %5, %cst {dimension_numbers = #tpu.dot_dimension_numbers<[1], [0], [0], [1], [0, 0, 1, 1], [], []>} : vector<16x32xf32>, vector<32x96xf32>, vector<16x96xf32> -> vector<16x96xf32>
    %13 = vector.broadcast %7 : vector<1x96xf32> to vector<16x96xf32>
    %14 = arith.addf %12, %13 : vector<16x96xf32>
    %15 = vector.extract_strided_slice %14 {offsets = [0, 0], sizes = [16, 32], strides = [1, 1]} : vector<16x96xf32> to vector<16x32xf32>
    %16 = vector.extract_strided_slice %14 {offsets = [0, 32], sizes = [16, 32], strides = [1, 1]} : vector<16x96xf32> to vector<16x32xf32>
    %17 = vector.extract_strided_slice %14 {offsets = [0, 64], sizes = [16, 32], strides = [1, 1]} : vector<16x96xf32> to vector<16x32xf32>
    %cst_14 = arith.constant 0.353553385 : f32
    %18 = vector.broadcast %cst_14 : f32 to vector<16x32xf32>
    %19 = arith.mulf %15, %18 : vector<16x32xf32>
    %20 = vector.extract_strided_slice %19 {offsets = [0, 0], sizes = [8, 8], strides = [1, 1]} : vector<16x32xf32> to vector<8x8xf32>
    %21 = vector.extract_strided_slice %19 {offsets = [0, 8], sizes = [8, 8], strides = [1, 1]} : vector<16x32xf32> to vector<8x8xf32>
    %22 = vector.extract_strided_slice %19 {offsets = [0, 16], sizes = [8, 8], strides = [1, 1]} : vector<16x32xf32> to vector<8x8xf32>
    %23 = vector.extract_strided_slice %19 {offsets = [0, 24], sizes = [8, 8], strides = [1, 1]} : vector<16x32xf32> to vector<8x8xf32>
    %24 = vector.extract_strided_slice %19 {offsets = [8, 0], sizes = [8, 8], strides = [1, 1]} : vector<16x32xf32> to vector<8x8xf32>
    %25 = vector.extract_strided_slice %19 {offsets = [8, 8], sizes = [8, 8], strides = [1, 1]} : vector<16x32xf32> to vector<8x8xf32>
    %26 = vector.extract_strided_slice %19 {offsets = [8, 16], sizes = [8, 8], strides = [1, 1]} : vector<16x32xf32> to vector<8x8xf32>
    %27 = vector.extract_strided_slice %19 {offsets = [8, 24], sizes = [8, 8], strides = [1, 1]} : vector<16x32xf32> to vector<8x8xf32>
    %28 = vector.shape_cast %20 : vector<8x8xf32> to vector<1x8x8xf32>
    %29 = vector.shape_cast %21 : vector<8x8xf32> to vector<1x8x8xf32>
    %30 = vector.shape_cast %22 : vector<8x8xf32> to vector<1x8x8xf32>
    %31 = vector.shape_cast %23 : vector<8x8xf32> to vector<1x8x8xf32>
    %32 = vector.shape_cast %24 : vector<8x8xf32> to vector<1x8x8xf32>
    %33 = vector.shape_cast %25 : vector<8x8xf32> to vector<1x8x8xf32>
    %34 = vector.shape_cast %26 : vector<8x8xf32> to vector<1x8x8xf32>
    %35 = vector.shape_cast %27 : vector<8x8xf32> to vector<1x8x8xf32>
    %36 = tpu.concatenate %28, %29, %30, %31, %32, %33, %34, %35 in 0 : vector<1x8x8xf32>, vector<1x8x8xf32>, vector<1x8x8xf32>, vector<1x8x8xf32>, vector<1x8x8xf32>, vector<1x8x8xf32>, vector<1x8x8xf32>, vector<1x8x8xf32> -> vector<8x8x8xf32>
    %37 = vector.extract_strided_slice %16 {offsets = [0, 0], sizes = [8, 8], strides = [1, 1]} : vector<16x32xf32> to vector<8x8xf32>
    %38 = vector.extract_strided_slice %16 {offsets = [0, 8], sizes = [8, 8], strides = [1, 1]} : vector<16x32xf32> to vector<8x8xf32>
    %39 = vector.extract_strided_slice %16 {offsets = [0, 16], sizes = [8, 8], strides = [1, 1]} : vector<16x32xf32> to vector<8x8xf32>
    %40 = vector.extract_strided_slice %16 {offsets = [0, 24], sizes = [8, 8], strides = [1, 1]} : vector<16x32xf32> to vector<8x8xf32>
    %41 = vector.extract_strided_slice %16 {offsets = [8, 0], sizes = [8, 8], strides = [1, 1]} : vector<16x32xf32> to vector<8x8xf32>
    %42 = vector.extract_strided_slice %16 {offsets = [8, 8], sizes = [8, 8], strides = [1, 1]} : vector<16x32xf32> to vector<8x8xf32>
    %43 = vector.extract_strided_slice %16 {offsets = [8, 16], sizes = [8, 8], strides = [1, 1]} : vector<16x32xf32> to vector<8x8xf32>
    %44 = vector.extract_strided_slice %16 {offsets = [8, 24], sizes = [8, 8], strides = [1, 1]} : vector<16x32xf32> to vector<8x8xf32>
    %45 = vector.shape_cast %37 : vector<8x8xf32> to vector<1x8x8xf32>
    %46 = vector.shape_cast %38 : vector<8x8xf32> to vector<1x8x8xf32>
    %47 = vector.shape_cast %39 : vector<8x8xf32> to vector<1x8x8xf32>
    %48 = vector.shape_cast %40 : vector<8x8xf32> to vector<1x8x8xf32>
    %49 = vector.shape_cast %41 : vector<8x8xf32> to vector<1x8x8xf32>
    %50 = vector.shape_cast %42 : vector<8x8xf32> to vector<1x8x8xf32>
    %51 = vector.shape_cast %43 : vector<8x8xf32> to vector<1x8x8xf32>
    %52 = vector.shape_cast %44 : vector<8x8xf32> to vector<1x8x8xf32>
    %53 = tpu.concatenate %45, %46, %47, %48, %49, %50, %51, %52 in 0 : vector<1x8x8xf32>, vector<1x8x8xf32>, vector<1x8x8xf32>, vector<1x8x8xf32>, vector<1x8x8xf32>, vector<1x8x8xf32>, vector<1x8x8xf32>, vector<1x8x8xf32> -> vector<8x8x8xf32>
    %54 = vector.extract_strided_slice %17 {offsets = [0, 0], sizes = [8, 8], strides = [1, 1]} : vector<16x32xf32> to vector<8x8xf32>
    %55 = vector.extract_strided_slice %17 {offsets = [0, 8], sizes = [8, 8], strides = [1, 1]} : vector<16x32xf32> to vector<8x8xf32>
    %56 = vector.extract_strided_slice %17 {offsets = [0, 16], sizes = [8, 8], strides = [1, 1]} : vector<16x32xf32> to vector<8x8xf32>
    %57 = vector.extract_strided_slice %17 {offsets = [0, 24], sizes = [8, 8], strides = [1, 1]} : vector<16x32xf32> to vector<8x8xf32>
    %58 = vector.extract_strided_slice %17 {offsets = [8, 0], sizes = [8, 8], strides = [1, 1]} : vector<16x32xf32> to vector<8x8xf32>
    %59 = vector.extract_strided_slice %17 {offsets = [8, 8], sizes = [8, 8], strides = [1, 1]} : vector<16x32xf32> to vector<8x8xf32>
    %60 = vector.extract_strided_slice %17 {offsets = [8, 16], sizes = [8, 8], strides = [1, 1]} : vector<16x32xf32> to vector<8x8xf32>
    %61 = vector.extract_strided_slice %17 {offsets = [8, 24], sizes = [8, 8], strides = [1, 1]} : vector<16x32xf32> to vector<8x8xf32>
    %62 = vector.shape_cast %54 : vector<8x8xf32> to vector<1x8x8xf32>
    %63 = vector.shape_cast %55 : vector<8x8xf32> to vector<1x8x8xf32>
    %64 = vector.shape_cast %56 : vector<8x8xf32> to vector<1x8x8xf32>
    %65 = vector.shape_cast %57 : vector<8x8xf32> to vector<1x8x8xf32>
    %66 = vector.shape_cast %58 : vector<8x8xf32> to vector<1x8x8xf32>
    %67 = vector.shape_cast %59 : vector<8x8xf32> to vector<1x8x8xf32>
    %68 = vector.shape_cast %60 : vector<8x8xf32> to vector<1x8x8xf32>
    %69 = vector.shape_cast %61 : vector<8x8xf32> to vector<1x8x8xf32>
    %70 = tpu.concatenate %62, %63, %64, %65, %66, %67, %68, %69 in 0 : vector<1x8x8xf32>, vector<1x8x8xf32>, vector<1x8x8xf32>, vector<1x8x8xf32>, vector<1x8x8xf32>, vector<1x8x8xf32>, vector<1x8x8xf32>, vector<1x8x8xf32> -> vector<8x8x8xf32>
    %cst_15 = arith.constant dense<0.000000e+00> : vector<8x8x8xf32>
    %71 = tpu.matmul %36, %53, %cst_15 {dimension_numbers = #tpu.dot_dimension_numbers<[2], [2], [1], [1], [0, 0, 0, 1, 1, 1], [0], [0]>} : vector<8x8x8xf32>, vector<8x8x8xf32>, vector<8x8x8xf32> -> vector<8x8x8xf32>
    %cst_16 = arith.constant dense<0xFF800000> : vector<8x8xf32>
    %72 = vector.multi_reduction <maximumf>, %71, %cst_16 [2] : vector<8x8x8xf32> to vector<8x8xf32>
    %73 = vector.shape_cast %72 : vector<8x8xf32> to vector<8x8x1xf32>
    %74 = vector.broadcast %73 : vector<8x8x1xf32> to vector<8x8x8xf32>
    %75 = arith.subf %71, %74 : vector<8x8x8xf32>
    %76 = math.exp %75 : vector<8x8x8xf32>
    %cst_17 = arith.constant dense<0.000000e+00> : vector<8x8xf32>
    %77 = vector.multi_reduction <add>, %76, %cst_17 [2] : vector<8x8x8xf32> to vector<8x8xf32>
    %78 = vector.shape_cast %77 : vector<8x8xf32> to vector<8x8x1xf32>
    %79 = tpu.reciprocal %78 {approx = true} : vector<8x8x1xf32> -> vector<8x8x1xf32>
    %80 = vector.broadcast %79 : vector<8x8x1xf32> to vector<8x8x8xf32>
    %81 = arith.mulf %76, %80 : vector<8x8x8xf32>
    %cst_18 = arith.constant dense<0.000000e+00> : vector<8x8x8xf32>
    %82 = tpu.matmul %81, %70, %cst_18 {dimension_numbers = #tpu.dot_dimension_numbers<[2], [1], [1], [2], [0, 0, 0, 1, 1, 2], [0], [0]>} : vector<8x8x8xf32>, vector<8x8x8xf32>, vector<8x8x8xf32> -> vector<8x8x8xf32>
    %83 = vector.extract_strided_slice %82 {offsets = [0, 0, 0], sizes = [1, 8, 8], strides = [1, 1, 1]} : vector<8x8x8xf32> to vector<1x8x8xf32>
    %84 = vector.shape_cast %83 : vector<1x8x8xf32> to vector<8x8xf32>
    %85 = vector.extract_strided_slice %9 {offsets = [0, 0], sizes = [8, 32], strides = [1, 1]} : vector<32x32xf32> to vector<8x32xf32>
    %cst_19 = arith.constant dense<0.000000e+00> : vector<8x32xf32>
    %86 = tpu.matmul %84, %85, %cst_19 {dimension_numbers = #tpu.dot_dimension_numbers<[1], [0], [0], [1], [0, 0, 1, 1], [], []>} : vector<8x8xf32>, vector<8x32xf32>, vector<8x32xf32> -> vector<8x32xf32>
    %87 = vector.extract_strided_slice %82 {offsets = [1, 0, 0], sizes = [1, 8, 8], strides = [1, 1, 1]} : vector<8x8x8xf32> to vector<1x8x8xf32>
    %88 = vector.shape_cast %87 : vector<1x8x8xf32> to vector<8x8xf32>
    %89 = vector.extract_strided_slice %9 {offsets = [8, 0], sizes = [8, 32], strides = [1, 1]} : vector<32x32xf32> to vector<8x32xf32>
    %cst_20 = arith.constant dense<0.000000e+00> : vector<8x32xf32>
    %90 = tpu.matmul %88, %89, %cst_20 {dimension_numbers = #tpu.dot_dimension_numbers<[1], [0], [0], [1], [0, 0, 1, 1], [], []>} : vector<8x8xf32>, vector<8x32xf32>, vector<8x32xf32> -> vector<8x32xf32>
    %91 = arith.addf %86, %90 : vector<8x32xf32>
    %92 = vector.extract_strided_slice %82 {offsets = [2, 0, 0], sizes = [1, 8, 8], strides = [1, 1, 1]} : vector<8x8x8xf32> to vector<1x8x8xf32>
    %93 = vector.shape_cast %92 : vector<1x8x8xf32> to vector<8x8xf32>
    %94 = vector.extract_strided_slice %9 {offsets = [16, 0], sizes = [8, 32], strides = [1, 1]} : vector<32x32xf32> to vector<8x32xf32>
    %cst_21 = arith.constant dense<0.000000e+00> : vector<8x32xf32>
    %95 = tpu.matmul %93, %94, %cst_21 {dimension_numbers = #tpu.dot_dimension_numbers<[1], [0], [0], [1], [0, 0, 1, 1], [], []>} : vector<8x8xf32>, vector<8x32xf32>, vector<8x32xf32> -> vector<8x32xf32>
    %96 = arith.addf %91, %95 : vector<8x32xf32>
    %97 = vector.extract_strided_slice %82 {offsets = [3, 0, 0], sizes = [1, 8, 8], strides = [1, 1, 1]} : vector<8x8x8xf32> to vector<1x8x8xf32>
    %98 = vector.shape_cast %97 : vector<1x8x8xf32> to vector<8x8xf32>
    %99 = vector.extract_strided_slice %9 {offsets = [24, 0], sizes = [8, 32], strides = [1, 1]} : vector<32x32xf32> to vector<8x32xf32>
    %cst_22 = arith.constant dense<0.000000e+00> : vector<8x32xf32>
    %100 = tpu.matmul %98, %99, %cst_22 {dimension_numbers = #tpu.dot_dimension_numbers<[1], [0], [0], [1], [0, 0, 1, 1], [], []>} : vector<8x8xf32>, vector<8x32xf32>, vector<8x32xf32> -> vector<8x32xf32>
    %101 = arith.addf %96, %100 : vector<8x32xf32>
    %102 = vector.extract_strided_slice %82 {offsets = [4, 0, 0], sizes = [1, 8, 8], strides = [1, 1, 1]} : vector<8x8x8xf32> to vector<1x8x8xf32>
    %103 = vector.shape_cast %102 : vector<1x8x8xf32> to vector<8x8xf32>
    %104 = vector.extract_strided_slice %9 {offsets = [0, 0], sizes = [8, 32], strides = [1, 1]} : vector<32x32xf32> to vector<8x32xf32>
    %cst_23 = arith.constant dense<0.000000e+00> : vector<8x32xf32>
    %105 = tpu.matmul %103, %104, %cst_23 {dimension_numbers = #tpu.dot_dimension_numbers<[1], [0], [0], [1], [0, 0, 1, 1], [], []>} : vector<8x8xf32>, vector<8x32xf32>, vector<8x32xf32> -> vector<8x32xf32>
    %106 = vector.extract_strided_slice %82 {offsets = [5, 0, 0], sizes = [1, 8, 8], strides = [1, 1, 1]} : vector<8x8x8xf32> to vector<1x8x8xf32>
    %107 = vector.shape_cast %106 : vector<1x8x8xf32> to vector<8x8xf32>
    %108 = vector.extract_strided_slice %9 {offsets = [8, 0], sizes = [8, 32], strides = [1, 1]} : vector<32x32xf32> to vector<8x32xf32>
    %cst_24 = arith.constant dense<0.000000e+00> : vector<8x32xf32>
    %109 = tpu.matmul %107, %108, %cst_24 {dimension_numbers = #tpu.dot_dimension_numbers<[1], [0], [0], [1], [0, 0, 1, 1], [], []>} : vector<8x8xf32>, vector<8x32xf32>, vector<8x32xf32> -> vector<8x32xf32>
    %110 = arith.addf %105, %109 : vector<8x32xf32>
    %111 = vector.extract_strided_slice %82 {offsets = [6, 0, 0], sizes = [1, 8, 8], strides = [1, 1, 1]} : vector<8x8x8xf32> to vector<1x8x8xf32>
    %112 = vector.shape_cast %111 : vector<1x8x8xf32> to vector<8x8xf32>
    %113 = vector.extract_strided_slice %9 {offsets = [16, 0], sizes = [8, 32], strides = [1, 1]} : vector<32x32xf32> to vector<8x32xf32>
    %cst_25 = arith.constant dense<0.000000e+00> : vector<8x32xf32>
    %114 = tpu.matmul %112, %113, %cst_25 {dimension_numbers = #tpu.dot_dimension_numbers<[1], [0], [0], [1], [0, 0, 1, 1], [], []>} : vector<8x8xf32>, vector<8x32xf32>, vector<8x32xf32> -> vector<8x32xf32>
    %115 = arith.addf %110, %114 : vector<8x32xf32>
    %116 = vector.extract_strided_slice %82 {offsets = [7, 0, 0], sizes = [1, 8, 8], strides = [1, 1, 1]} : vector<8x8x8xf32> to vector<1x8x8xf32>
    %117 = vector.shape_cast %116 : vector<1x8x8xf32> to vector<8x8xf32>
    %118 = vector.extract_strided_slice %9 {offsets = [24, 0], sizes = [8, 32], strides = [1, 1]} : vector<32x32xf32> to vector<8x32xf32>
    %cst_26 = arith.constant dense<0.000000e+00> : vector<8x32xf32>
    %119 = tpu.matmul %117, %118, %cst_26 {dimension_numbers = #tpu.dot_dimension_numbers<[1], [0], [0], [1], [0, 0, 1, 1], [], []>} : vector<8x8xf32>, vector<8x32xf32>, vector<8x32xf32> -> vector<8x32xf32>
    %120 = arith.addf %115, %119 : vector<8x32xf32>
    %121 = tpu.concatenate %101, %120 in 0 : vector<8x32xf32>, vector<8x32xf32> -> vector<16x32xf32>
    %122 = vector.broadcast %11 : vector<1x32xf32> to vector<16x32xf32>
    %123 = arith.addf %121, %122 : vector<16x32xf32>
    %c0_27 = arith.constant 0 : index
    %c0_28 = arith.constant 0 : index
    %c0_29 = arith.constant 0 : index
    %124 = vector.load %arg10[%c0_27, %c0_28, %c0_29] : memref<1x1x32xf32, #tpu.memory_space<vmem>>, vector<1x1x32xf32>
    %125 = vector.shape_cast %124 : vector<1x1x32xf32> to vector<1x32xf32>
    %c0_30 = arith.constant 0 : index
    %c0_31 = arith.constant 0 : index
    %c0_32 = arith.constant 0 : index
    %126 = vector.load %arg11[%c0_30, %c0_31, %c0_32] : memref<1x1x32xf32, #tpu.memory_space<vmem>>, vector<1x1x32xf32>
    %127 = vector.shape_cast %126 : vector<1x1x32xf32> to vector<1x32xf32>
    %128 = arith.addf %3, %123 : vector<16x32xf32>
    %cst_33 = arith.constant dense<0.000000e+00> : vector<16xf32>
    %129 = vector.multi_reduction <add>, %128, %cst_33 [1] : vector<16x32xf32> to vector<16xf32>
    %130 = vector.shape_cast %129 : vector<16xf32> to vector<16x1xf32>
    %cst_34 = arith.constant 3.200000e+01 : f32
    %131 = vector.broadcast %cst_34 : f32 to vector<16x1xf32>
    %132 = arith.divf %130, %131 : vector<16x1xf32>
    %133 = vector.broadcast %132 : vector<16x1xf32> to vector<16x32xf32>
    %134 = arith.subf %128, %133 : vector<16x32xf32>
    %135 = arith.mulf %134, %134 : vector<16x32xf32>
    %cst_35 = arith.constant dense<0.000000e+00> : vector<16xf32>
    %136 = vector.multi_reduction <add>, %135, %cst_35 [1] : vector<16x32xf32> to vector<16xf32>
    %137 = vector.shape_cast %136 : vector<16xf32> to vector<16x1xf32>
    %cst_36 = arith.constant 3.200000e+01 : f32
    %138 = vector.broadcast %cst_36 : f32 to vector<16x1xf32>
    %139 = arith.divf %137, %138 : vector<16x1xf32>
    %140 = vector.broadcast %132 : vector<16x1xf32> to vector<16x32xf32>
    %141 = arith.subf %128, %140 : vector<16x32xf32>
    %cst_37 = arith.constant 9.99999974E-6 : f32
    %142 = vector.broadcast %cst_37 : f32 to vector<16x1xf32>
    %143 = arith.addf %139, %142 : vector<16x1xf32>
    %144 = math.rsqrt %143 : vector<16x1xf32>
    %145 = vector.broadcast %144 : vector<16x1xf32> to vector<16x32xf32>
    %146 = arith.mulf %141, %145 : vector<16x32xf32>
    %147 = vector.broadcast %125 : vector<1x32xf32> to vector<16x32xf32>
    %148 = arith.mulf %146, %147 : vector<16x32xf32>
    %149 = vector.broadcast %127 : vector<1x32xf32> to vector<16x32xf32>
    %150 = arith.addf %148, %149 : vector<16x32xf32>
    %c0_38 = arith.constant 0 : index
    %c0_39 = arith.constant 0 : index
    %c0_40 = arith.constant 0 : index
    %151 = vector.load %arg6[%c0_38, %c0_39, %c0_40] : memref<1x32x64xf32, #tpu.memory_space<vmem>>, vector<1x32x64xf32>
    %152 = vector.shape_cast %151 : vector<1x32x64xf32> to vector<32x64xf32>
    %c0_41 = arith.constant 0 : index
    %c0_42 = arith.constant 0 : index
    %c0_43 = arith.constant 0 : index
    %153 = vector.load %arg7[%c0_41, %c0_42, %c0_43] : memref<1x1x64xf32, #tpu.memory_space<vmem>>, vector<1x1x64xf32>
    %154 = vector.shape_cast %153 : vector<1x1x64xf32> to vector<1x64xf32>
    %c0_44 = arith.constant 0 : index
    %c0_45 = arith.constant 0 : index
    %c0_46 = arith.constant 0 : index
    %155 = vector.load %arg8[%c0_44, %c0_45, %c0_46] : memref<1x64x32xf32, #tpu.memory_space<vmem>>, vector<1x64x32xf32>
    %156 = vector.shape_cast %155 : vector<1x64x32xf32> to vector<64x32xf32>
    %c0_47 = arith.constant 0 : index
    %c0_48 = arith.constant 0 : index
    %c0_49 = arith.constant 0 : index
    %157 = vector.load %arg9[%c0_47, %c0_48, %c0_49] : memref<1x1x32xf32, #tpu.memory_space<vmem>>, vector<1x1x32xf32>
    %158 = vector.shape_cast %157 : vector<1x1x32xf32> to vector<1x32xf32>
    %cst_50 = arith.constant dense<0.000000e+00> : vector<16x64xf32>
    %159 = tpu.matmul %150, %152, %cst_50 {dimension_numbers = #tpu.dot_dimension_numbers<[1], [0], [0], [1], [0, 0, 1, 1], [], []>} : vector<16x32xf32>, vector<32x64xf32>, vector<16x64xf32> -> vector<16x64xf32>
    %160 = vector.broadcast %154 : vector<1x64xf32> to vector<16x64xf32>
    %161 = arith.addf %159, %160 : vector<16x64xf32>
    %cst_51 = arith.constant 0.000000e+00 : f32
    %162 = vector.broadcast %cst_51 : f32 to vector<16x64xf32>
    %163 = arith.maximumf %161, %162 : vector<16x64xf32>
    %cst_52 = arith.constant dense<0.000000e+00> : vector<16x32xf32>
    %164 = tpu.matmul %163, %156, %cst_52 {dimension_numbers = #tpu.dot_dimension_numbers<[1], [0], [0], [1], [0, 0, 1, 1], [], []>} : vector<16x64xf32>, vector<64x32xf32>, vector<16x32xf32> -> vector<16x32xf32>
    %165 = vector.broadcast %158 : vector<1x32xf32> to vector<16x32xf32>
    %166 = arith.addf %164, %165 : vector<16x32xf32>
    %c0_53 = arith.constant 0 : index
    %c0_54 = arith.constant 0 : index
    %c0_55 = arith.constant 0 : index
    %167 = vector.load %arg12[%c0_53, %c0_54, %c0_55] : memref<1x1x32xf32, #tpu.memory_space<vmem>>, vector<1x1x32xf32>
    %168 = vector.shape_cast %167 : vector<1x1x32xf32> to vector<1x32xf32>
    %c0_56 = arith.constant 0 : index
    %c0_57 = arith.constant 0 : index
    %c0_58 = arith.constant 0 : index
    %169 = vector.load %arg13[%c0_56, %c0_57, %c0_58] : memref<1x1x32xf32, #tpu.memory_space<vmem>>, vector<1x1x32xf32>
    %170 = vector.shape_cast %169 : vector<1x1x32xf32> to vector<1x32xf32>
    %171 = arith.addf %150, %166 : vector<16x32xf32>
    %cst_59 = arith.constant dense<0.000000e+00> : vector<16xf32>
    %172 = vector.multi_reduction <add>, %171, %cst_59 [1] : vector<16x32xf32> to vector<16xf32>
    %173 = vector.shape_cast %172 : vector<16xf32> to vector<16x1xf32>
    %cst_60 = arith.constant 3.200000e+01 : f32
    %174 = vector.broadcast %cst_60 : f32 to vector<16x1xf32>
    %175 = arith.divf %173, %174 : vector<16x1xf32>
    %176 = vector.broadcast %175 : vector<16x1xf32> to vector<16x32xf32>
    %177 = arith.subf %171, %176 : vector<16x32xf32>
    %178 = arith.mulf %177, %177 : vector<16x32xf32>
    %cst_61 = arith.constant dense<0.000000e+00> : vector<16xf32>
    %179 = vector.multi_reduction <add>, %178, %cst_61 [1] : vector<16x32xf32> to vector<16xf32>
    %180 = vector.shape_cast %179 : vector<16xf32> to vector<16x1xf32>
    %cst_62 = arith.constant 3.200000e+01 : f32
    %181 = vector.broadcast %cst_62 : f32 to vector<16x1xf32>
    %182 = arith.divf %180, %181 : vector<16x1xf32>
    %183 = vector.broadcast %175 : vector<16x1xf32> to vector<16x32xf32>
    %184 = arith.subf %171, %183 : vector<16x32xf32>
    %cst_63 = arith.constant 9.99999974E-6 : f32
    %185 = vector.broadcast %cst_63 : f32 to vector<16x1xf32>
    %186 = arith.addf %182, %185 : vector<16x1xf32>
    %187 = math.rsqrt %186 : vector<16x1xf32>
    %188 = vector.broadcast %187 : vector<16x1xf32> to vector<16x32xf32>
    %189 = arith.mulf %184, %188 : vector<16x32xf32>
    %190 = vector.broadcast %168 : vector<1x32xf32> to vector<16x32xf32>
    %191 = arith.mulf %189, %190 : vector<16x32xf32>
    %192 = vector.broadcast %170 : vector<1x32xf32> to vector<16x32xf32>
    %193 = arith.addf %191, %192 : vector<16x32xf32>
    %c0_64 = arith.constant 0 : index
    %c0_65 = arith.constant 0 : index
    %194 = vector.load %arg16[%c0_64, %c0_65] : memref<16x32xf32, #tpu.memory_space<vmem>>, vector<16x32xf32>
    tpu.vector_store %arg16[%c0_64, %c0_65], %193 {strides = array<i32>} : memref<16x32xf32, #tpu.memory_space<vmem>>, vector<16x32xf32>,
    %c1_i32 = arith.constant 1 : i32
    %195 = arith.cmpi eq, %arg0, %c1_i32 : i32
    %196 = arith.extui %195 : i1 to i32
    %c0_i32_66 = arith.constant 0 : i32
    %197 = arith.cmpi ne, %196, %c0_i32_66 : i32
    scf.if %197 {
      %c0_67 = arith.constant 0 : index
      %c0_68 = arith.constant 0 : index
      %198 = vector.load %arg16[%c0_67, %c0_68] : memref<16x32xf32, #tpu.memory_space<vmem>>, vector<16x32xf32>
      %c0_69 = arith.constant 0 : index
      %c0_70 = arith.constant 0 : index
      %199 = vector.load %arg14[%c0_69, %c0_70] : memref<1x32xf32, #tpu.memory_space<vmem>>, vector<1x32xf32>
      %c0_71 = arith.constant 0 : index
      %c0_72 = arith.constant 0 : index
      %200 = vector.load %arg15[%c0_71, %c0_72] : memref<1x32xf32, #tpu.memory_space<vmem>>, vector<1x32xf32>
      %cst_73 = arith.constant dense<0.000000e+00> : vector<16xf32>
      %201 = vector.multi_reduction <add>, %198, %cst_73 [1] : vector<16x32xf32> to vector<16xf32>
      %202 = vector.shape_cast %201 : vector<16xf32> to vector<16x1xf32>
      %cst_74 = arith.constant 3.200000e+01 : f32
      %203 = vector.broadcast %cst_74 : f32 to vector<16x1xf32>
      %204 = arith.divf %202, %203 : vector<16x1xf32>
      %205 = vector.broadcast %204 : vector<16x1xf32> to vector<16x32xf32>
      %206 = arith.subf %198, %205 : vector<16x32xf32>
      %207 = arith.mulf %206, %206 : vector<16x32xf32>
      %cst_75 = arith.constant dense<0.000000e+00> : vector<16xf32>
      %208 = vector.multi_reduction <add>, %207, %cst_75 [1] : vector<16x32xf32> to vector<16xf32>
      %209 = vector.shape_cast %208 : vector<16xf32> to vector<16x1xf32>
      %cst_76 = arith.constant 3.200000e+01 : f32
      %210 = vector.broadcast %cst_76 : f32 to vector<16x1xf32>
      %211 = arith.divf %209, %210 : vector<16x1xf32>
      %212 = vector.broadcast %204 : vector<16x1xf32> to vector<16x32xf32>
      %213 = arith.subf %198, %212 : vector<16x32xf32>
      %cst_77 = arith.constant 9.99999974E-6 : f32
      %214 = vector.broadcast %cst_77 : f32 to vector<16x1xf32>
      %215 = arith.addf %211, %214 : vector<16x1xf32>
      %216 = math.rsqrt %215 : vector<16x1xf32>
      %217 = vector.broadcast %216 : vector<16x1xf32> to vector<16x32xf32>
      %218 = arith.mulf %213, %217 : vector<16x32xf32>
      %219 = vector.broadcast %199 : vector<1x32xf32> to vector<16x32xf32>
      %220 = arith.mulf %218, %219 : vector<16x32xf32>
      %221 = vector.broadcast %200 : vector<1x32xf32> to vector<16x32xf32>
      %222 = arith.addf %220, %221 : vector<16x32xf32>
      %c0_78 = arith.constant 0 : index
      %c0_79 = arith.constant 0 : index
      %223 = vector.load %arg16[%c0_78, %c0_79] : memref<16x32xf32, #tpu.memory_space<vmem>>, vector<16x32xf32>
      tpu.vector_store %arg16[%c0_78, %c0_79], %222 {strides = array<i32>} : memref<16x32xf32, #tpu.memory_space<vmem>>, vector<16x32xf32>,
    } else {
    }
    return
  }
  func.func @transform_0(%arg0: i32) -> (i32, i32) {
    %c0_i32 = arith.constant 0 : i32
    %c0_i32_0 = arith.constant 0 : i32
    %c0_i32_1 = arith.constant 0 : i32
    return %c0_i32, %c0_i32_0 : i32, i32
  }
  func.func @transform_1(%arg0: i32) -> (i32, i32, i32) {
    %c0_i32 = arith.constant 0 : i32
    %c0_i32_0 = arith.constant 0 : i32
    %c0_i32_1 = arith.constant 0 : i32
    return %arg0, %c0_i32, %c0_i32_0 : i32, i32, i32
  }
  func.func @transform_2(%arg0: i32) -> (i32, i32, i32) {
    %c0_i32 = arith.constant 0 : i32
    %c0_i32_0 = arith.constant 0 : i32
    %c0_i32_1 = arith.constant 0 : i32
    return %arg0, %c0_i32, %c0_i32_0 : i32, i32, i32
  }
  func.func @transform_3(%arg0: i32) -> (i32, i32, i32) {
    %c0_i32 = arith.constant 0 : i32
    %c0_i32_0 = arith.constant 0 : i32
    %c0_i32_1 = arith.constant 0 : i32
    return %arg0, %c0_i32, %c0_i32_0 : i32, i32, i32
  }
  func.func @transform_4(%arg0: i32) -> (i32, i32, i32) {
    %c0_i32 = arith.constant 0 : i32
    %c0_i32_0 = arith.constant 0 : i32
    %c0_i32_1 = arith.constant 0 : i32
    return %arg0, %c0_i32, %c0_i32_0 : i32, i32, i32
  }
  func.func @transform_5(%arg0: i32) -> (i32, i32, i32) {
    %c0_i32 = arith.constant 0 : i32
    %c0_i32_0 = arith.constant 0 : i32
    %c0_i32_1 = arith.constant 0 : i32
    return %arg0, %c0_i32, %c0_i32_0 : i32, i32, i32
  }
  func.func @transform_6(%arg0: i32) -> (i32, i32, i32) {
    %c0_i32 = arith.constant 0 : i32
    %c0_i32_0 = arith.constant 0 : i32
    %c0_i32_1 = arith.constant 0 : i32
    return %arg0, %c0_i32, %c0_i32_0 : i32, i32, i32
  }
  func.func @transform_7(%arg0: i32) -> (i32, i32, i32) {
    %c0_i32 = arith.constant 0 : i32
    %c0_i32_0 = arith.constant 0 : i32
    %c0_i32_1 = arith.constant 0 : i32
    return %arg0, %c0_i32, %c0_i32_0 : i32, i32, i32
  }
  func.func @transform_8(%arg0: i32) -> (i32, i32, i32) {
    %c0_i32 = arith.constant 0 : i32
    %c0_i32_0 = arith.constant 0 : i32
    %c0_i32_1 = arith.constant 0 : i32
    return %arg0, %c0_i32, %c0_i32_0 : i32, i32, i32
  }
  func.func @transform_9(%arg0: i32) -> (i32, i32, i32) {
    %c0_i32 = arith.constant 0 : i32
    %c0_i32_0 = arith.constant 0 : i32
    %c0_i32_1 = arith.constant 0 : i32
    return %arg0, %c0_i32, %c0_i32_0 : i32, i32, i32
  }
  func.func @transform_10(%arg0: i32) -> (i32, i32, i32) {
    %c0_i32 = arith.constant 0 : i32
    %c0_i32_0 = arith.constant 0 : i32
    %c0_i32_1 = arith.constant 0 : i32
    return %arg0, %c0_i32, %c0_i32_0 : i32, i32, i32
  }
  func.func @transform_11(%arg0: i32) -> (i32, i32, i32) {
    %c0_i32 = arith.constant 0 : i32
    %c0_i32_0 = arith.constant 0 : i32
    %c0_i32_1 = arith.constant 0 : i32
    return %arg0, %c0_i32, %c0_i32_0 : i32, i32, i32
  }
  func.func @transform_12(%arg0: i32) -> (i32, i32, i32) {
    %c0_i32 = arith.constant 0 : i32
    %c0_i32_0 = arith.constant 0 : i32
    %c0_i32_1 = arith.constant 0 : i32
    return %arg0, %c0_i32, %c0_i32_0 : i32, i32, i32
  }
  func.func @transform_13(%arg0: i32) -> (i32, i32) {
    %c0_i32 = arith.constant 0 : i32
    %c0_i32_0 = arith.constant 0 : i32
    %c0_i32_1 = arith.constant 0 : i32
    return %c0_i32, %c0_i32_0 : i32, i32
  }
  func.func @transform_14(%arg0: i32) -> (i32, i32) {
    %c0_i32 = arith.constant 0 : i32
    %c0_i32_0 = arith.constant 0 : i32
    %c0_i32_1 = arith.constant 0 : i32
    return %c0_i32, %c0_i32_0 : i32, i32
  }
  func.func @transform_15(%arg0: i32) -> (i32, i32) {
    %c0_i32 = arith.constant 0 : i32
    %c0_i32_0 = arith.constant 0 : i32
    %c0_i32_1 = arith.constant 0 : i32
    return %c0_i32, %c0_i32_0 : i32, i32
  }
}

</mosaic_0001>

<bundles_post_ra>
// kernel: tpu_custom_call.1
= control target key start
LH: loop header
LB: loop body
LE: loop exit
PB: predicated region body
PF: predicated region fallthrough
CT: control target
= control target key end

     0   :  { %s4198_s0 = inlined_call_operand.hbm [shape: f32[16,32], index: 0, kind: input, shape index: {}]   ;;  %s4199_s1 = inlined_call_operand.vmem [shape: f32[2,32,96], index: 1, kind: input, shape index: {}]   ;;  %s4200_s2 = inlined_call_operand.vmem [shape: f32[2,1,96], index: 2, kind: input, shape index: {}]   ;;  %s4201_s3 = inlined_call_operand.vmem [shape: f32[2,32,32], index: 3, kind: input, shape index: {}]   ;;  %s4202_s4 = inlined_call_operand.vmem [shape: f32[2,1,32], index: 4, kind: input, shape index: {}]   ;;  %s4203_s5 = inlined_call_operand.vmem [shape: f32[2,32,64], index: 5, kind: input, shape index: {}]   ;;  %s4204_s6 = inlined_call_operand.vmem [shape: f32[2,1,64], index: 6, kind: input, shape index: {}]   ;;  %s4205_s7 = inlined_call_operand.vmem [shape: f32[2,64,32], index: 7, kind: input, shape index: {}]   ;;  %s4206_s8 = inlined_call_operand.vmem [shape: f32[2,1,32], index: 8, kind: input, shape index: {}]   ;;  %s4207_s9 = inlined_call_operand.vmem [shape: f32[2,1,32], index: 9, kind: input, shape index: {}]   ;;  %s4208_s10 = inlined_call_operand.vmem [shape: f32[2,1,32], index: 10, kind: input, shape index: {}]   ;;  %s4209_s11 = inlined_call_operand.vmem [shape: f32[2,1,32], index: 11, kind: input, shape index: {}]   ;;  %s4210_s12 = inlined_call_operand.vmem [shape: f32[2,1,32], index: 12, kind: input, shape index: {}]   ;;  %s4211_s13 = inlined_call_operand.vmem [shape: f32[1,32], index: 13, kind: input, shape index: {}]   ;;  %s4212_s14 = inlined_call_operand.vmem [shape: f32[1,32], index: 14, kind: input, shape index: {}]   ;;  %s4213_s15 = inlined_call_operand.hbm [shape: f32[16,32], index: 15, kind: output, shape index: {}]  }
   0x1   :  { %4218 = sst [smem:[#allocation9_spill]] %s4198_s0 }
   0x2   :  { %4219 = sst [smem:[#allocation10_spill]] %s4199_s1 }
   0x3   :  { %4220 = sst [smem:[#allocation11_spill]] %s4201_s3 }
   0x4   :  { %4221 = sst [smem:[#allocation12_spill]] %s4203_s5 }
   0x5   :  { %4222 = sst [smem:[#allocation13_spill]] %s4211_s13 }
   0x6   :  { %4223 = sst [smem:[#allocation14_spill]] %s4212_s14 }
   0x7   :  { %4224 = sst [smem:[#allocation15_spill]] %s4213_s15 }
   0x8   :  { %20 = vsyncpa [#allocation3], 0 }
   0x9   :  { %21 = vsyncpa [#allocation4], 0  ;;  %s3793_s18 = smov 0  }
   0xa LB: > { %4225 = sst [smem:[#allocation8_spill]] %s3698_s18  ;;  %s3799_s19 = sadd.s32 4294967295, %s3698_s18   ;;  %s3698_s18 = sphi %s3793_s18, %s27_s18  }
   0xb   : > { %p3215_p0 = scmp.ge.s32.totalorder %s3698_s18, 1  ;;  %p428_p1 = scmp.lt.s32.totalorder %s3698_s18, 3 }
   0xc   : > { %s3700_s20 = smov [#allocation2]   ;;  %p4214_p4 = scmp.eq.s32.totalorder %s3799_s19, 0 }
   0xd   : > { %s440_s21 = sshll.u32 %s3700_s20, 4  ;;  %p3804_p3 = pnand %p3215_p0, %p428_p1  ;;  %s441_s21 = int_to_ptr.vmem [resolvable:$true] %s440_s21 }
   0xe   : > { %s4228_s0 = sld [smem:[#allocation9_spill]] }
   0xf   : > { %s4226_s22 = scalar_select %p3804_p3, 1, 0 }
  0x10   : > { %p3557_p5 = pneg %p3804_p3 }
  0x12   : > { %p3813_p6 = pnand %p4214_p4, %p3557_p5 }
  0x14   : > { %s3630_s26 = scalar_lea.hbm %s4228_s0, 256  ;;  %p3632_p8 = pneg %p3813_p6 }
  0x15   : > { %p3631_p7 = scmp.ne.s32.totalorder %s4228_s0, %s3630_s26  ;;  %p3637_p11 = scmp.lt.u32.totalorder %s3630_s26, %s4228_s0 }
  0x17   : > { %p3633_p9 = pnand %p3632_p8, %p3631_p7 }
  0x19   : > { %p3634_p10 = pneg %p3633_p9 }
  0x1b   : > { %p3639_p12 = pnand %p3637_p11, %p3634_p10 }
  0x1d   : > { %3642 = shalt.err (!%p3639_p12)
}
  0x1e   : > { %s3643_s16 = scalar_lea.vmem %s441_s21, 256  ;;  %p3651_p5 = scmp.lt.s32.totalorder %s441_s21, %s441_s21 }
  0x1f   : > { %p3644_p13 = scmp.ne.s32.totalorder %s441_s21, %s3643_s16  ;;  %p3652_p2 = scmp.lt.s32.totalorder %s3643_s16, %s3643_s16 }
  0x21   : > { %p3646_p0 = pnand %p3644_p13, %p3632_p8  ;;  %p3653_p4 = por %p3652_p2, %p3651_p5 }
  0x23   : > { %p3647_p1 = pneg %p3646_p0 }
  0x25   : > { %p3654_p3 = pnand %p3653_p4, %p3647_p1 }
  0x27   : > { %3657 = shalt.err (!%p3654_p3)
}
  0x28   : > { %s3701_s17 = smov 128   ;;  %s3702_s20 = smov 8  }
  0x29   : > { %3560 = dma.hbm_to_vmem [thread:$0]  (!%p3813_p6), %s4228_s0, 256, %s441_s21, [#allocation3], %s3701_s17, %s3701_s17, %s3702_s20  }
  0x2a   : > { %p4229_p7 = scmp.ne.s32.totalorder %s4226_s22, 0 }
  0x2b   : > { %p4230_p9 = scmp.eq.s32.totalorder (!%p4229_p7), %s3799_s19, 0 }
  0x2c   : > { %542 = sbr.rel (%p4229_p7) target bundleno = 2920 (0xb68), region = 80 }
  0x33   : > { %3689 = dma.done.wait (%p4230_p9), [#allocation3], 256   ;;  %p4231_p8 = pmov %p4230_p9 }
  0x34   : > { %p624_p2 = scmp.lt.s32.totalorder %s3799_s19, 1  ;;  %s4232_s1 = sld [smem:[#allocation10_spill]] }
  0x35   : > { %3691 = vsyncadd (%p4231_p8), [#allocation3], 4294967040  ;;  %s4233_s3 = sld [smem:[#allocation11_spill]]  ;;  %s4234_s5 = sld [smem:[#allocation12_spill]] }
  0x36   : > { %s3841_s26 = scalar_select %p624_p2, %s3799_s19, 1 }
  0x37   : > { %p4235_p3 = scmp.ne.s32.totalorder %s3799_s19, 0 }
  0x38   : > { %s3282_s21 = sshll.u32 %s3841_s26, 5  ;;  %s3285_s28 = sshll.u32 %s3841_s26, 6  ;;  %v672_v0 = vld [vmem:[#allocation2] sm:$0xff] (!%p4235_p3)  ;;  %vm674_vm0 = vcmask (!%p4235_p3), 261120   ;;  %v673_v1 = vld [vmem:[#allocation2 + $0x8] sm:$0xff] (!%p4235_p3) }
  0x39   : > { %s3873_s16 = scalar_lea.vmem %s4205_s7, %s3285_s28  ;;  %s655_s24 = scalar_lea.vmem %s4206_s8, %s3841_s26  ;;  %675 = vst.msk [vmem:[#allocation5] sm:$0xff] (!%p4235_p3), %vm674_vm0, %v672_v0  ;;  %676 = vst.msk [vmem:[#allocation5 + $0x8] sm:$0xff] (!%p4235_p3), %vm674_vm0, %v673_v1 }
  0x3a   : > { %s628_s30 = scalar_lea.vmem %s4232_s1, %s3282_s21  ;;  %s658_s15 = scalar_lea.vmem %s4207_s9, %s3841_s26 }
  0x3b   : > { %s3854_s20 = scalar_lea.vmem %s4233_s3, %s3282_s21  ;;  %s3863_s14 = scalar_lea.vmem %s4234_s5, %s3282_s21 }
  0x3c   : > { %s661_s5 = scalar_lea.vmem %s4208_s10, %s3841_s26  ;;  %s664_s27 = scalar_lea.vmem %s4209_s11, %s3841_s26 }
  0x3d   : > { %s667_s28 = scalar_lea.vmem %s4210_s12, %s3841_s26  ;;  %671 = sbr.rel (%p4235_p3) target bundleno = 68 (0x44), region = 88 }
  0x44 PF: > { %v679_v2 = vld [vmem:[%s628_s30] sm:$0xff]  ;;  %v680_v3 = vld [vmem:[%s628_s30 + $0x8] sm:$0xff]  ;;  %v681_v4 = vld [vmem:[%s628_s30 + $0x10] sm:$0xff]  ;;  %vm695_vm1 = vcmask 261120   ;;  %s4236_s13 = scalar_lea.vmem %s4200_s2, %s3841_s26  ;;  %v3703_v12 = vmov 0.0   ;;  %s3705_s29 = smov 120  }
  0x45   : > { %v3517_v5 = vpack.c.bf16 %v680_v3, %v679_v2  ;;  %v682_v6 = vld [vmem:[%s628_s30 + $0x18] sm:$0xff]  ;;  %v3897_v7 = vld [vmem:[#allocation5] sm:$0xff]  ;;  %v3229_v10 = vld [vmem:[%s4236_s13] ss:$0 sm:$0xff]  ;;  %3372 = vmatprep.subr.mxu1 %v3703_v12  ;;  %s3704_s30 = smov 104   ;;  %vm3706_vm2 = vmmov 0   ;;  %s4237_s22 = scalar_lea.vmem %s4202_s4, %s3841_s26 }
  0x46   : > { %v3521_v8 = vpack.c.bf16 %v682_v6, %v681_v4  ;;  %3364 = vmatprep.mubr.msk.f32.mxu0 %vm695_vm1, %v3897_v7  ;;  %v3901_v9 = vld [vmem:[#allocation5 + $0x8] sm:$0xff]  ;;  %3374 = vmatprep.mubr.msk.f32.mxu1 %vm3706_vm2, %v3703_v12  ;;  %s3707_s17 = smov 112   ;;  %s3708_s25 = smov 96   ;;  %vm809_vm3 = vcmask 64512   ;;  %vm2864_vm4 = vcmask 523264  }
  0x47   : > { %3518 = vmatprep.subr.bf16.mxu0 %v3517_v5  ;;  %s3709_s18 = smov 64   ;;  %p3275_p4 = scmp.ne.s32.totalorder %s3799_s19, 1 }
  0x48   : > { %3520 = vmatpush3.bf16.msra.mxu0 %v3517_v5 }
  0x49   : > { %3522 = vmatprep.subr.bf16.mxu0 %v3521_v8 }
  0x4c   : > { %3524 = vmatpush3.bf16.msra.mxu0 %v3521_v8 }
  0x4d   : > { %3367 = vmatprep.subr.mxu0 %v3703_v12 }
  0x4f   : > { %3365 = vmatmul.mubr.msk.f32.vlgmr.msra.gmra.mrb[0].mxu0 %vm695_vm1, %v3901_v9 }
  0x50   : > { %3369 = vmatprep.mubr.msk.f32.mxu0 %vm3706_vm2, %v3703_v12 }
 0x122   : > { %v3366_v11 = vpop.f32.mrb[0].mxu0 }
 0x123   : > { %v768_v13 = vpop.f32.mrb[1].mxu0  ;;  %v3922_v15 = vadd.f32 %v3366_v11, %v3229_v10 }
 0x124   : > { %v3912_v14 = vadd.f32 %v3229_v10, %v768_v13 }
 0x125   : > { %v778_v22 = vmul.f32 0.35355338, %v3922_v15 }
 0x126   : > { %798 = vrot.lane.b32.xlu1 %v3912_v14, %s3704_s30  ;;  %794 = vrot.lane.b32.xlu0 %v3912_v14, %s3705_s29  ;;  %v777_v16 = vmul.f32 0.35355338, %v3912_v14 }
 0x12a   : > { %801 = vrot.lane.b32.xlu1 %v3922_v15, %s3705_s29  ;;  %796 = vrot.lane.b32.xlu0 %v3912_v14, %s3707_s17 }
 0x12e   : > { %805 = vrot.lane.b32.xlu1 %v3922_v15, %s3704_s30  ;;  %803 = vrot.lane.b32.xlu0 %v3922_v15, %s3707_s17 }
 0x132   : > { %807 = vrot.lane.b32.xlu0 %v3912_v14, %s3708_s25  ;;  %782 = vrot.lane.b32.xlu1 %v777_v16, %s3707_s17 }
 0x136   : > { %780 = vrot.lane.b32.xlu0 %v777_v16, %s3705_s29 }
 0x13a   : > { %784 = vrot.lane.b32.xlu0 %v777_v16, %s3704_s30 }
 0x198   : > { %v3934_v17 = vpop.permute.xlu1 %798  ;;  %v3936_v18 = vpop.permute.xlu0 %794 }
 0x199   : > { %884 = vrot.lane.b32.xlu1 %v3936_v18, %s3708_s25  ;;  %1036 = vrot.lane.b32.xlu0 %v3934_v17, %s3708_s25 }
 0x19c   : > { %v3940_v19 = vpop.permute.xlu1 %801  ;;  %v3942_v20 = vpop.permute.xlu0 %796 }
 0x19d   : > { %960 = vrot.lane.b32.xlu1 %v3942_v20, %s3708_s25  ;;  %1188 = vrot.lane.b32.xlu0 %v3940_v19, %s3708_s25 }
 0x1a0   : > { %v3946_v21 = vpop.permute.xlu0 %803  ;;  %v3954_v24 = vpop.permute.xlu1 %805 }
 0x1a1   : > { %1112 = vrot.lane.b32.xlu1 %v3922_v15, %s3708_s25  ;;  %1264 = vrot.lane.b32.xlu0 %v3946_v21, %s3708_s25 }
 0x1a4   : > { %v808_v23 = vpop.permute.xlu0 %807  ;;  %v783_v26 = vpop.permute.xlu1 %782 }
 0x1a5   : > { %3368 = vmatpush3.xpose.msk.msra.mxu0 %vm809_vm3, %v808_v23  ;;  %787 = vrot.lane.b32.xlu1 %v778_v22, %s3705_s29 }
 0x1a6   : > { %789 = vrot.lane.b32.xlu0 %v778_v22, %s3707_s17  ;;  %3377 = vmatprep.subr.mxu0 %v3703_v12 }
 0x1a8   : > { %3370 = vmatmul.mubr.msk.f32.vlgmr.msra.gmra.mrb[2].mxu0 %vm809_vm3, %v777_v16  ;;  %v781_v25 = vpop.permute.xlu0 %780 }
 0x1a9   : > { %1340 = vrot.lane.b32.xlu1 %v3954_v24, %s3708_s25  ;;  %3379 = vmatprep.mubr.msk.f32.mxu0 %vm3706_vm2, %v3703_v12 }
 0x1ac   : > { %v785_v27 = vpop.permute.xlu0 %784 }
 0x1ad   : > { %791 = vrot.lane.b32.xlu1 %v778_v22, %s3704_s30 }
 0x20b   : > { %v885_v28 = vpop.permute.xlu1 %884  ;;  %v1037_v29 = vpop.permute.xlu0 %1036 }
 0x20c   : > { %3373 = vmatpush3.xpose.msk.msra.mxu1 %vm809_vm3, %v885_v28 }
 0x20d   : > { %3382 = vmatprep.subr.mxu1 %v3703_v12 }
 0x20f   : > { %v961_v30 = vpop.permute.xlu1 %960  ;;  %3375 = vmatmul.mubr.msk.f32.vlgmr.msra.gmra.mrb[0].mxu1 %vm809_vm3, %v781_v25  ;;  %v1189_v31 = vpop.permute.xlu0 %1188 }
 0x210   : > { %3378 = vmatpush3.xpose.msk.msra.mxu0 %vm809_vm3, %v961_v30  ;;  %3383 = vmatpush3.xpose.msk.msra.mxu1 %vm809_vm3, %v1037_v29 }
 0x211   : > { %3384 = vmatprep.mubr.msk.f32.mxu1 %vm3706_vm2, %v3703_v12  ;;  %3392 = vmatprep.subr.mxu1 %v3703_v12 }
 0x212   : > { %3387 = vmatprep.subr.mxu0 %v3703_v12 }
 0x213   : > { %v1113_v32 = vpop.permute.xlu1 %1112  ;;  %3385 = vmatmul.mubr.msk.f32.vlgmr.msra.gmra.mrb[2].mxu1 %vm809_vm3, %v785_v27  ;;  %3380 = vmatmul.mubr.msk.f32.vlgmr.msra.gmra.mrb[4].mxu0 %vm809_vm3, %v783_v26  ;;  %v1265_v33 = vpop.permute.xlu0 %1264 }
 0x214   : > { %3388 = vmatpush3.xpose.msk.msra.mxu0 %vm809_vm3, %v1113_v32  ;;  %3393 = vmatpush3.xpose.msk.msra.mxu1 %vm809_vm3, %v1189_v31 }
 0x215   : > { %3389 = vmatprep.mubr.msk.f32.mxu0 %vm3706_vm2, %v3703_v12  ;;  %3394 = vmatprep.mubr.msk.f32.mxu1 %vm3706_vm2, %v3703_v12 }
 0x216   : > { %3397 = vmatprep.subr.mxu0 %v3703_v12  ;;  %3402 = vmatprep.subr.mxu1 %v3703_v12 }
 0x217   : > { %v788_v34 = vpop.permute.xlu1 %787  ;;  %3390 = vmatmul.mubr.msk.f32.vlgmr.msra.gmra.mrb[6].mxu0 %vm809_vm3, %v778_v22 }
 0x218   : > { %3395 = vmatmul.mubr.msk.f32.vlgmr.msra.gmra.mrb[4].mxu1 %vm809_vm3, %v788_v34  ;;  %3398 = vmatpush3.xpose.msk.msra.mxu0 %vm809_vm3, %v1265_v33  ;;  %v790_v35 = vpop.permute.xlu0 %789 }
 0x219   : > { %3399 = vmatprep.mubr.msk.f32.mxu0 %vm3706_vm2, %v3703_v12  ;;  %3404 = vmatprep.mubr.msk.f32.mxu1 %vm3706_vm2, %v3703_v12 }
 0x21a   : > { %3407 = vmatprep.subr.mxu0 %v3703_v12 }
 0x21b   : > { %v1341_v36 = vpop.permute.xlu1 %1340  ;;  %3400 = vmatmul.mubr.msk.f32.vlgmr.msra.gmra.mrb[8].mxu0 %vm809_vm3, %v790_v35 }
 0x21c   : > { %3403 = vmatpush3.xpose.msk.msra.mxu1 %vm809_vm3, %v1341_v36  ;;  %3409 = vmatprep.mubr.msk.f32.mxu0 %vm3706_vm2, %v3703_v12 }
 0x21d   : > { %3412 = vmatprep.subr.mxu1 %v3703_v12 }
 0x21f   : > { %v792_v37 = vpop.permute.xlu1 %791 }
 0x220   : > { %3405 = vmatmul.mubr.msk.f32.vlgmr.msra.gmra.mrb[6].mxu1 %vm809_vm3, %v792_v37 }
 0x221   : > { %3414 = vmatprep.mubr.msk.f32.mxu1 %vm3706_vm2, %v3703_v12 }
 0x27b   : > { %v880_v38 = vpop.f32.mrb[2].mxu0 }
 0x27c   : > { %v3371_v39 = vpop.f32.mrb[3].mxu0  ;;  %v1416_v40 = vsel %vm809_vm3, %v880_v38, -inf }
 0x27d   : > { %1417 = vmax.xlane.f32.xlu0 %v1416_v40 }
 0x2e2   : > { %v956_v41 = vpop.f32.mrb[0].mxu1 }
 0x2e3   : > { %v3376_v42 = vpop.f32.mrb[1].mxu1  ;;  %v1419_v43 = vsel %vm809_vm3, %v956_v41, -inf }
 0x2e4   : > { %1420 = vmax.xlane.f32.xlu1 %v1419_v43 }
 0x2e6   : > { %v1032_v44 = vpop.f32.mrb[4].mxu0  ;;  %v1108_v45 = vpop.f32.mrb[2].mxu1 }
 0x2e7   : > { %v3381_v46 = vpop.f32.mrb[5].mxu0  ;;  %v3386_v47 = vpop.f32.mrb[3].mxu1  ;;  %v1422_v48 = vsel %vm809_vm3, %v1032_v44, -inf  ;;  %v1425_v52 = vsel %vm809_vm3, %v1108_v45, -inf }
 0x2e8   : > { %1423 = vmax.xlane.f32.xlu0 %v1422_v48 }
 0x2ea   : > { %v1184_v49 = vpop.f32.mrb[6].mxu0 }
 0x2eb   : > { %v3391_v50 = vpop.f32.mrb[7].mxu0  ;;  %v1260_v51 = vpop.f32.mrb[4].mxu1  ;;  %v1428_v53 = vsel %vm809_vm3, %v1184_v49, -inf }
 0x2ec   : > { %v3396_v54 = vpop.f32.mrb[5].mxu1  ;;  %1426 = vmax.xlane.f32.xlu0 %v1425_v52  ;;  %1429 = vmax.xlane.f32.xlu1 %v1428_v53  ;;  %v1431_v57 = vsel %vm809_vm3, %v1260_v51, -inf }
 0x2ee   : > { %v1336_v55 = vpop.f32.mrb[8].mxu0 }
 0x2ef   : > { %v3401_v56 = vpop.f32.mrb[9].mxu0  ;;  %v1434_v58 = vsel %vm809_vm3, %v1336_v55, -inf }
 0x2f0   : > { %1432 = vmax.xlane.f32.xlu0 %v1431_v57  ;;  %1435 = vmax.xlane.f32.xlu1 %v1434_v58 }
 0x2f3   : > { %v1412_v59 = vpop.f32.mrb[6].mxu1 }
 0x2f4   : > { %v3406_v60 = vpop.f32.mrb[7].mxu1  ;;  %v1437_v61 = vsel %vm809_vm3, %v1412_v59, -inf }
 0x2f5   : > { %1438 = vmax.xlane.f32.xlu0 %v1437_v61 }
 0x301   : > { %1504 = vrot.lane.b32.xlu1 %v3912_v14, %s3709_s18 }
 0x305   : > { %1656 = vrot.lane.b32.xlu1 %v3942_v20, %s3709_s18 }
 0x309   : > { %1732 = vrot.lane.b32.xlu1 %v3934_v17, %s3709_s18 }
 0x30a   : > { %v1418_v62 = vpop.xlane.xlu0 %1417 }
 0x30b   : > { %1580 = vrot.lane.b32.xlu0 %v3936_v18, %s3709_s18  ;;  %v1440_v63 = vsub.f32 %v880_v38, %v1418_v62 }
 0x30d   : > { %1884 = vrot.lane.b32.xlu1 %v3940_v19, %s3709_s18  ;;  %v1448_v0 = vmul.f32 1.442695, %v1440_v63 }
 0x30f   : > { %1808 = vrot.lane.b32.xlu0 %v3922_v15, %s3709_s18  ;;  %3586 = vpow2.f32 %v1448_v0 }
 0x319   : > { %v4016_v1 = vpop.eup %3586 }
 0x31a   : > { %v1464_v2 = vsel %vm809_vm3, %v4016_v1, 0.0 }
 0x331   : > { %1465 = vadd.xlane.f32.xlu1 %v1464_v2 }
 0x371   : > { %v1421_v3 = vpop.xlane.xlu1 %1420 }
 0x372   : > { %v1441_v4 = vsub.f32 %v956_v41, %v1421_v3 }
 0x374   : > { %v1450_v5 = vmul.f32 1.442695, %v1441_v4 }
 0x375   : > { %v1424_v6 = vpop.xlane.xlu0 %1423 }
 0x376   : > { %3588 = vpow2.f32 %v1450_v5  ;;  %v1442_v8 = vsub.f32 %v1032_v44, %v1424_v6 }
 0x378   : > { %v1452_v10 = vmul.f32 1.442695, %v1442_v8 }
 0x379   : > { %v1427_v11 = vpop.xlane.xlu0 %1426  ;;  %v1430_v13 = vpop.xlane.xlu1 %1429 }
 0x37a   : > { %3590 = vpow2.f32 %v1452_v10  ;;  %v1443_v14 = vsub.f32 %v1108_v45, %v1427_v11  ;;  %v1444_v15 = vsub.f32 %v1184_v49, %v1430_v13  ;;  %v684_v11 = vld [vmem:[%s3854_s20] sm:$0xff]  ;;  %v685_v13 = vld [vmem:[%s3854_s20 + $0x8] sm:$0xff] }
 0x37c   : > { %v1454_v16 = vmul.f32 1.442695, %v1443_v14  ;;  %v1456_v17 = vmul.f32 1.442695, %v1444_v15  ;;  %v687_v14 = vld [vmem:[%s3854_s20 + $0x18] sm:$0xff] }
 0x37d   : > { %v1433_v18 = vpop.xlane.xlu0 %1432  ;;  %v1436_v19 = vpop.xlane.xlu1 %1435 }
 0x37e   : > { %3592 = vpow2.f32 %v1454_v16  ;;  %v1445_v20 = vsub.f32 %v1260_v51, %v1433_v18  ;;  %v1446_v22 = vsub.f32 %v1336_v55, %v1436_v19 }
 0x37f   : > { %3594 = vpow2.f32 %v1456_v17  ;;  %v686_v17 = vld [vmem:[%s3854_s20 + $0x10] sm:$0xff]  ;;  %s4240_s20 = sld [smem:[#allocation14_spill]] (!%p3275_p4) }
 0x380   : > { %v3589_v23 = vpop.eup %3588  ;;  %v1458_v25 = vmul.f32 1.442695, %v1445_v20  ;;  %v1460_v26 = vmul.f32 1.442695, %v1446_v22 }
 0x381   : > { %v1505_v27 = vpop.permute.xlu1 %1504  ;;  %v1467_v28 = vsel %vm809_vm3, %v3589_v23, 0.0 }
 0x382   : > { %3596 = vpow2.f32 %v1458_v25  ;;  %1468 = vadd.xlane.f32.xlu0 %v1467_v28  ;;  %v1439_v29 = vpop.xlane.xlu0 %1438  ;;  %3408 = vmatpush3.msra.mxu0 %v1505_v27 }
 0x383   : > { %3598 = vpow2.f32 %v1460_v26  ;;  %v1447_v30 = vsub.f32 %v1412_v59, %v1439_v29  ;;  %3417 = vmatprep.subr.mxu0 %v3703_v12 }
 0x384   : > { %v3591_v31 = vpop.eup %3590 }
 0x385   : > { %v1462_v32 = vmul.f32 1.442695, %v1447_v30  ;;  %v1470_v33 = vsel %vm809_vm3, %v3591_v31, 0.0  ;;  %v1657_v45 = vpop.permute.xlu1 %1656 }
 0x386   : > { %v1581_v34 = vpop.permute.xlu0 %1580  ;;  %1471 = vadd.xlane.f32.xlu1 %v1470_v33 }
 0x387   : > { %3600 = vpow2.f32 %v1462_v32  ;;  %3413 = vmatpush3.msra.mxu1 %v1581_v34 }
 0x388   : > { %v3593_v35 = vpop.eup %3592  ;;  %3422 = vmatprep.subr.mxu1 %v3703_v12 }
 0x389   : > { %v3595_v36 = vpop.eup %3594  ;;  %v1473_v37 = vsel %vm809_vm3, %v3593_v35, 0.0  ;;  %v1733_v46 = vpop.permute.xlu1 %1732 }
 0x38a   : > { %1474 = vadd.xlane.f32.xlu0 %v1473_v37  ;;  %v1476_v38 = vsel %vm809_vm3, %v3595_v36, 0.0 }
 0x38b   : > { %1477 = vadd.xlane.f32.xlu1 %v1476_v38 }
 0x38c   : > { %v3597_v39 = vpop.eup %3596 }
 0x38d   : > { %v3599_v40 = vpop.eup %3598  ;;  %v1479_v41 = vsel %vm809_vm3, %v3597_v39, 0.0  ;;  %v1885_v47 = vpop.permute.xlu1 %1884 }
 0x38e   : > { %1480 = vadd.xlane.f32.xlu0 %v1479_v41  ;;  %v1482_v42 = vsel %vm809_vm3, %v3599_v40, 0.0 }
 0x38f   : > { %1483 = vadd.xlane.f32.xlu1 %v1482_v42  ;;  %v3264_v42 = vld [vmem:[%s4237_s22] ss:$0 sm:$0xff] }
 0x391   : > { %v4028_v43 = vpop.eup %3600 }
 0x392   : > { %v1485_v44 = vsel %vm809_vm3, %v4028_v43, 0.0 }
 0x393   : > { %1486 = vadd.xlane.f32.xlu0 %v1485_v44 }
 0x3a0   : > { %2036 = vrot.lane.b32.xlu1 %v3954_v24, %s3709_s18  ;;  %v1809_v24 = vpop.permute.xlu0 %1808 }
 0x3a9   : > { %1960 = vrot.lane.b32.xlu0 %v3946_v21, %s3709_s18 }
 0x3be   : > { %v1466_v48 = vpop.xlane.xlu1 %1465 }
 0x3bf   : > { %3602 = vrcp.f32 %v1466_v48 }
 0x3c9   : > { %v3603_v49 = vpop.eup %3602 }
 0x3ca   : > { %v1496_v50 = vmul.f32 %v3603_v49, %v4016_v1 }
 0x3cc   : > { %3410 = vmatmul.mubr.msk.f32.vlgmr.msra.gmra.mrb[10].mxu0 %vm809_vm3, %v1496_v50 }
 0x3cd   : > { %3418 = vmatpush3.msra.mxu0 %v1657_v45  ;;  %3419 = vmatprep.mubr.msk.f32.mxu0 %vm3706_vm2, %v3703_v12 }
 0x3ce   : > { %3427 = vmatprep.subr.mxu0 %v3703_v12 }
 0x40f   : > { %v1469_v51 = vpop.xlane.xlu0 %1468 }
 0x410   : > { %3604 = vrcp.f32 %v1469_v51 }
 0x413   : > { %v1472_v21 = vpop.xlane.xlu1 %1471 }
 0x414   : > { %3606 = vrcp.f32 %v1472_v21 }
 0x417   : > { %v1475_v52 = vpop.xlane.xlu0 %1474 }
 0x418   : > { %3608 = vrcp.f32 %v1475_v52  ;;  %v1478_v53 = vpop.xlane.xlu1 %1477 }
 0x419   : > { %3610 = vrcp.f32 %v1478_v53 }
 0x41a   : > { %v3605_v54 = vpop.eup %3604 }
 0x41b   : > { %v1497_v55 = vmul.f32 %v3605_v54, %v3589_v23  ;;  %v1481_v56 = vpop.xlane.xlu0 %1480 }
 0x41c   : > { %3612 = vrcp.f32 %v1481_v56  ;;  %v1484_v57 = vpop.xlane.xlu1 %1483 }
 0x41d   : > { %3614 = vrcp.f32 %v1484_v57  ;;  %3415 = vmatmul.mubr.msk.f32.vlgmr.msra.gmra.mrb[8].mxu1 %vm809_vm3, %v1497_v55 }
 0x41e   : > { %v3607_v58 = vpop.eup %3606  ;;  %3423 = vmatpush3.msra.mxu1 %v1733_v46  ;;  %3424 = vmatprep.mubr.msk.f32.mxu1 %vm3706_vm2, %v3703_v12 }
 0x41f   : > { %v1498_v59 = vmul.f32 %v3607_v58, %v3591_v31  ;;  %3432 = vmatprep.subr.mxu1 %v3703_v12 }
 0x420   : > { %v1487_v60 = vpop.xlane.xlu0 %1486  ;;  %v2037_v6 = vpop.permute.xlu1 %2036 }
 0x421   : > { %3616 = vrcp.f32 %v1487_v60  ;;  %3420 = vmatmul.mubr.msk.f32.vlgmr.msra.gmra.mrb[12].mxu0 %vm809_vm3, %v1498_v59 }
 0x422   : > { %v3609_v61 = vpop.eup %3608  ;;  %3428 = vmatpush3.msra.mxu0 %v1809_v24  ;;  %3429 = vmatprep.mubr.msk.f32.mxu0 %vm3706_vm2, %v3703_v12 }
 0x423   : > { %v3611_v62 = vpop.eup %3610  ;;  %v1499_v63 = vmul.f32 %v3609_v61, %v3593_v35  ;;  %3437 = vmatprep.subr.mxu0 %v3703_v12 }
 0x424   : > { %v1500_v0 = vmul.f32 %v3611_v62, %v3595_v36  ;;  %v1961_v1 = vpop.permute.xlu0 %1960 }
 0x425   : > { %3425 = vmatmul.mubr.msk.f32.vlgmr.msra.gmra.mrb[10].mxu1 %vm809_vm3, %v1499_v63 }
 0x426   : > { %v3613_v2 = vpop.eup %3612  ;;  %3430 = vmatmul.mubr.msk.f32.vlgmr.msra.gmra.mrb[14].mxu0 %vm809_vm3, %v1500_v0  ;;  %3433 = vmatpush3.msra.mxu1 %v1885_v47 }
 0x427   : > { %v3615_v3 = vpop.eup %3614  ;;  %v1501_v4 = vmul.f32 %v3613_v2, %v3597_v39  ;;  %3438 = vmatpush3.msra.mxu0 %v1961_v1  ;;  %3434 = vmatprep.mubr.msk.f32.mxu1 %vm3706_vm2, %v3703_v12 }
 0x428   : > { %v1502_v5 = vmul.f32 %v3615_v3, %v3599_v40  ;;  %3439 = vmatprep.mubr.msk.f32.mxu0 %vm3706_vm2, %v3703_v12  ;;  %3442 = vmatprep.subr.mxu1 %v3703_v12 }
 0x429   : > { %3435 = vmatmul.mubr.msk.f32.vlgmr.msra.gmra.mrb[12].mxu1 %vm809_vm3, %v1501_v4  ;;  %3447 = vmatprep.subr.mxu0 %v3703_v12  ;;  %v2755_v4 = vld [vmem:[%s3863_s14] sm:$0xff] }
 0x42a   : > { %3440 = vmatmul.mubr.msk.f32.vlgmr.msra.gmra.mrb[16].mxu0 %vm809_vm3, %v1502_v5  ;;  %3443 = vmatpush3.msra.mxu1 %v2037_v6  ;;  %v2756_v5 = vld [vmem:[%s3863_s14 + $0x8] sm:$0xff] }
 0x42b   : > { %v3617_v8 = vpop.eup %3616  ;;  %3444 = vmatprep.mubr.msk.f32.mxu1 %vm3706_vm2, %v3703_v12  ;;  %3452 = vmatprep.subr.mxu1 %v3703_v12  ;;  %v3525_v6 = vpack.c.bf16 %v2756_v5, %v2755_v4 }
 0x42c   : > { %v1503_v10 = vmul.f32 %v3617_v8, %v4028_v43  ;;  %3449 = vmatprep.mubr.msk.f32.mxu0 %vm3706_vm2, %v3703_v12  ;;  %3448 = vmatpush3.msra.mxu0 %v685_v13  ;;  %v2757_v8 = vld [vmem:[%s3863_s14 + $0x10] sm:$0xff] }
 0x42d   : > { %3457 = vmatprep.subr.mxu0 %v3703_v12 }
 0x42e   : > { %3445 = vmatmul.mubr.msk.f32.vlgmr.msra.gmra.mrb[14].mxu1 %vm809_vm3, %v1503_v10  ;;  %v2758_v10 = vld [vmem:[%s3863_s14 + $0x18] sm:$0xff] }
 0x42f   : > { %3453 = vmatpush3.msra.mxu1 %v684_v11  ;;  %3454 = vmatprep.mubr.msk.f32.mxu1 %vm3706_vm2, %v3703_v12 }
 0x430   : > { %3462 = vmatprep.subr.mxu1 %v3703_v12 }
 0x49f   : > { %v1576_v15 = vpop.f32.mrb[10].mxu0 }
 0x4a0   : > { %v3411_v16 = vpop.f32.mrb[11].mxu0  ;;  %3455 = vmatmul.mubr.msk.f32.vlgmr.msra.gmra.mrb[16].mxu1 %vm809_vm3, %v1576_v15  ;;  %v2762_v15 = vld [vmem:[%s3873_s16 + $0x10] sm:$0xff] }
 0x4a1   : > { %3463 = vmatpush3.msra.mxu1 %v687_v14  ;;  %3464 = vmatprep.mubr.msk.f32.mxu1 %vm3706_vm2, %v3703_v12 }
 0x4a2   : > { %3472 = vmatprep.subr.mxu1 %v3703_v12 }
 0x4f0   : > { %v1652_v18 = vpop.f32.mrb[8].mxu1 }
 0x4f1   : > { %v3416_v19 = vpop.f32.mrb[9].mxu1  ;;  %3450 = vmatmul.mubr.msk.f32.vlgmr.msra.gmra.mrb[18].mxu0 %vm809_vm3, %v1652_v18 }
 0x4f2   : > { %3458 = vmatpush3.msra.mxu0 %v686_v17  ;;  %3459 = vmatprep.mubr.msk.f32.mxu0 %vm3706_vm2, %v3703_v12  ;;  %v2764_v19 = vld [vmem:[%s3873_s16 + $0x20] sm:$0xff] }
 0x4f3   : > { %3467 = vmatprep.subr.mxu0 %v3703_v12 }
 0x4f4   : > { %v1728_v20 = vpop.f32.mrb[12].mxu0 }
 0x4f5   : > { %v3421_v22 = vpop.f32.mrb[13].mxu0  ;;  %3460 = vmatmul.mubr.msk.f32.vlgmr.msra.gmra.mrb[20].mxu0 %vm809_vm3, %v1728_v20  ;;  %v2765_v20 = vld [vmem:[%s3873_s16 + $0x28] sm:$0xff] }
 0x4f6   : > { %3468 = vmatpush3.msra.mxu0 %v685_v13  ;;  %3469 = vmatprep.mubr.msk.f32.mxu0 %vm3706_vm2, %v3703_v12  ;;  %v2760_v13 = vld [vmem:[%s3873_s16] sm:$0xff]  ;;  %v3541_v22 = vpack.c.bf16 %v2765_v20, %v2764_v19 }
 0x4f7   : > { %3477 = vmatprep.subr.mxu0 %v3703_v12 }
 0x4f8   : > { %v1804_v23 = vpop.f32.mrb[10].mxu1 }
 0x4f9   : > { %v1880_v25 = vpop.f32.mrb[14].mxu0  ;;  %v3426_v26 = vpop.f32.mrb[11].mxu1  ;;  %3465 = vmatmul.mubr.msk.f32.vlgmr.msra.gmra.mrb[18].mxu1 %vm809_vm3, %v1804_v23 }
 0x4fa   : > { %v3431_v27 = vpop.f32.mrb[15].mxu0  ;;  %3473 = vmatpush3.msra.mxu1 %v684_v11  ;;  %3474 = vmatprep.mubr.msk.f32.mxu1 %vm3706_vm2, %v3703_v12  ;;  %v3529_v11 = vpack.c.bf16 %v2758_v10, %v2757_v8  ;;  %v3273_v8 = vld [vmem:[%s664_s27] ss:$0 sm:$0xff] }
 0x4fb   : > { %3482 = vmatprep.subr.mxu1 %v3703_v12 }
 0x4fc   : > { %v1956_v28 = vpop.f32.mrb[12].mxu1 }
 0x4fd   : > { %v2032_v29 = vpop.f32.mrb[16].mxu0  ;;  %v3436_v30 = vpop.f32.mrb[13].mxu1  ;;  %3470 = vmatmul.mubr.msk.f32.vlgmr.msra.gmra.mrb[22].mxu0 %vm809_vm3, %v1956_v28  ;;  %3475 = vmatmul.mubr.msk.f32.vlgmr.msra.gmra.mrb[20].mxu1 %vm809_vm3, %v1880_v25 }
 0x4fe   : > { %v3441_v31 = vpop.f32.mrb[17].mxu0  ;;  %3478 = vmatpush3.msra.mxu0 %v686_v17  ;;  %3479 = vmatprep.mubr.msk.f32.mxu0 %vm3706_vm2, %v3703_v12  ;;  %v2763_v17 = vld [vmem:[%s3873_s16 + $0x18] sm:$0xff] }
 0x4ff   : > { %3483 = vmatpush3.msra.mxu1 %v687_v14  ;;  %3484 = vmatprep.mubr.msk.f32.mxu1 %vm3706_vm2, %v3703_v12  ;;  %v2761_v14 = vld [vmem:[%s3873_s16 + $0x8] sm:$0xff]  ;;  %v3537_v18 = vpack.c.bf16 %v2763_v17, %v2762_v15  ;;  %v3265_v31 = vld [vmem:[%s658_s15] ss:$0 sm:$0xff] }
 0x500   : > { %3526 = vmatprep.subr.bf16.mxu0 %v3525_v6  ;;  %v3533_v16 = vpack.c.bf16 %v2761_v14, %v2760_v13  ;;  %v3274_v13 = vld [vmem:[%s667_s28] ss:$0 sm:$0xff]  ;;  %s4239_s28 = sld [smem:[#allocation13_spill]] (!%p3275_p4) }
 0x501   : > { %v2108_v32 = vpop.f32.mrb[14].mxu1  ;;  %3480 = vmatmul.mubr.msk.f32.vlgmr.msra.gmra.mrb[24].mxu0 %vm809_vm3, %v2032_v29 }
 0x502   : > { %v3446_v33 = vpop.f32.mrb[15].mxu1  ;;  %3485 = vmatmul.mubr.msk.f32.vlgmr.msra.gmra.mrb[22].mxu1 %vm809_vm3, %v2108_v32  ;;  %3528 = vmatpush3.bf16.msra.mxu0 %v3525_v6 }
 0x503   : > { %3530 = vmatprep.subr.bf16.mxu0 %v3529_v11  ;;  %3534 = vmatprep.subr.bf16.mxu1 %v3533_v16  ;;  %v3266_v33 = vld [vmem:[%s661_s5] ss:$0 sm:$0xff]  ;;  %s4238_s5 = scalar_lea.vmem %s4204_s6, %s3841_s26 }
 0x504   : > { %3536 = vmatpush3.bf16.msra.mxu1 %v3533_v16 }
 0x505   : > { %3538 = vmatprep.subr.bf16.mxu1 %v3537_v18 }
 0x506   : > { %3532 = vmatpush3.bf16.msra.mxu0 %v3529_v11 }
 0x508   : > { %3540 = vmatpush3.bf16.msra.mxu1 %v3537_v18 }
 0x509   : > { %3542 = vmatprep.subr.bf16.mxu1 %v3541_v22 }
 0x50c   : > { %3544 = vmatpush3.bf16.msra.mxu1 %v3541_v22 }
 0x573   : > { %v2254_v34 = vpop.f32.mrb[16].mxu1 }
 0x574   : > { %v3456_v35 = vpop.f32.mrb[17].mxu1 }
 0x5c4   : > { %v2181_v36 = vpop.f32.mrb[18].mxu0 }
 0x5c5   : > { %v2255_v37 = vadd.f32 %v2254_v34, %v2181_v36  ;;  %v3451_v38 = vpop.f32.mrb[19].mxu0 }
 0x5c8   : > { %v2327_v39 = vpop.f32.mrb[20].mxu0 }
 0x5c9   : > { %v2331_v40 = vadd.f32 %v2327_v39, %v2255_v37  ;;  %v3461_v41 = vpop.f32.mrb[21].mxu0 }
 0x5ca   : > { %v2767_v41 = vld [vmem:[%s3873_s16 + $0x38] sm:$0xff] }
 0x5cc   : > { %v2401_v12 = vpop.f32.mrb[18].mxu1 }
 0x5cd   : > { %v2405_v43 = vadd.f32 %v2401_v12, %v2331_v40  ;;  %v3466_v44 = vpop.f32.mrb[19].mxu1  ;;  %v2766_v40 = vld [vmem:[%s3873_s16 + $0x30] sm:$0xff]  ;;  %v3267_v12 = vld [vmem:[%s4238_s5] ss:$0 sm:$0xff] }
 0x5cf   : > { %v2706_v45 = vadd.f32 %v3264_v42, %v2405_v43 }
 0x5d0   : > { %v2475_v46 = vpop.f32.mrb[22].mxu0  ;;  %v2548_v47 = vpop.f32.mrb[20].mxu1 }
 0x5d1   : > { %v2549_v48 = vadd.f32 %v2548_v47, %v2475_v46  ;;  %v3471_v49 = vpop.f32.mrb[23].mxu0  ;;  %v3476_v50 = vpop.f32.mrb[21].mxu1  ;;  %v2710_v24 = vadd.f32 %v2706_v45, %v3897_v7 }
 0x5d2   : > { %v3270_v49 = vld [vmem:[%s655_s24] ss:$0 sm:$0xff] }
 0x5d3   : > { %v2712_v51 = vsel %vm695_vm1, %v2710_v24, 0.0 }
 0x5d4   : > { %2713 = vadd.xlane.f32.xlu0 %v2712_v51  ;;  %v2621_v21 = vpop.f32.mrb[24].mxu0 }
 0x5d5   : > { %v2625_v52 = vadd.f32 %v2621_v21, %v2549_v48  ;;  %v3481_v53 = vpop.f32.mrb[25].mxu0  ;;  %v2695_v54 = vpop.f32.mrb[22].mxu1 }
 0x5d6   : > { %v3486_v55 = vpop.f32.mrb[23].mxu1 }
 0x5d7   : > { %v2699_v56 = vadd.f32 %v2695_v54, %v2625_v52 }
 0x5d9   : > { %v2707_v57 = vadd.f32 %v3264_v42, %v2699_v56  ;;  %v3545_v42 = vpack.c.bf16 %v2767_v41, %v2766_v40 }
 0x5db   : > { %v2711_v58 = vadd.f32 %v2707_v57, %v3901_v9  ;;  %3546 = vmatprep.subr.bf16.mxu1 %v3545_v42 }
 0x5dc   : > { %3548 = vmatpush3.bf16.msra.mxu1 %v3545_v42  ;;  %v3276_v42 = vld [vmem:[%s4239_s28] ss:$0 sm:$0xff] (!%p3275_p4) }
 0x5dd   : > { %v2715_v59 = vsel %vm695_vm1, %v2711_v58, 0.0 }
 0x5de   : > { %2716 = vadd.xlane.f32.xlu1 %v2715_v59 }
 0x661   : > { %v2714_v60 = vpop.xlane.xlu0 %2713 }
 0x662   : > { %v2719_v61 = vmul.f32 0.03125, %v2714_v60 }
 0x664   : > { %v2721_v7 = vsub.f32 %v2710_v24, %v2719_v61 }
 0x666   : > { %v2723_v62 = vmul.f32 %v2721_v7, %v2721_v7 }
 0x668   : > { %v2725_v63 = vsel %vm695_vm1, %v2723_v62, 0.0 }
 0x669   : > { %2726 = vadd.xlane.f32.xlu0 %v2725_v63 }
 0x66b   : > { %v2717_v0 = vpop.xlane.xlu1 %2716 }
 0x66c   : > { %v2720_v1 = vmul.f32 0.03125, %v2717_v0 }
 0x66e   : > { %v2722_v2 = vsub.f32 %v2711_v58, %v2720_v1 }
 0x670   : > { %v2724_v9 = vmul.f32 %v2722_v2, %v2722_v2 }
 0x672   : > { %v2728_v3 = vsel %vm695_vm1, %v2724_v9, 0.0 }
 0x673   : > { %2729 = vadd.xlane.f32.xlu0 %v2728_v3 }
 0x6f6   : > { %v2727_v23 = vpop.xlane.xlu0 %2726 }
 0x6f7   : > { %v2731_v25 = vmul.f32 0.03125, %v2727_v23 }
 0x6f9   : > { %v2733_v26 = vadd.f32 1e-05, %v2731_v25 }
 0x6fb   : > { %3618 = vrsqrt.f32 %v2733_v26 }
 0x700   : > { %v2730_v27 = vpop.xlane.xlu0 %2729 }
 0x701   : > { %v2732_v28 = vmul.f32 0.03125, %v2730_v27 }
 0x703   : > { %v2734_v29 = vadd.f32 1e-05, %v2732_v28 }
 0x705   : > { %v3619_v30 = vpop.eup %3618  ;;  %3620 = vrsqrt.f32 %v2734_v29 }
 0x706   : > { %v2737_v32 = vmul.f32 %v3619_v30, %v2721_v7 }
 0x708   : > { %v2745_v34 = vmul.f32 %v3265_v31, %v2737_v32 }
 0x70a   : > { %v2753_v35 = vadd.f32 %v3266_v33, %v2745_v34 }
 0x70c   : > { %3495 = vmatprep.mubr.msk.f32.mxu0 %vm695_vm1, %v2753_v35 }
 0x70f   : > { %v3621_v36 = vpop.eup %3620 }
 0x710   : > { %v2738_v37 = vmul.f32 %v3621_v36, %v2722_v2 }
 0x712   : > { %v2746_v38 = vmul.f32 %v3265_v31, %v2738_v37 }
 0x714   : > { %v2754_v39 = vadd.f32 %v3266_v33, %v2746_v38 }
 0x716   : > { %3496 = vmatmul.mubr.msk.f32.vlgmr.msra.gmra.mrb[26].mxu0 %vm695_vm1, %v2754_v39 }
 0x7e9   : > { %v3497_v43 = vpop.f32.mrb[26].mxu0 }
 0x7ea   : > { %v2853_v44 = vadd.f32 %v3497_v43, %v3267_v12  ;;  %v2847_v45 = vpop.f32.mrb[27].mxu0  ;;  %v3277_v43 = vld [vmem:[%s4240_s20] ss:$0 sm:$0xff] (!%p3275_p4) }
 0x7eb   : > { %v2848_v46 = vadd.f32 %v3267_v12, %v2847_v45 }
 0x7ec   : > { %v2857_v48 = vmax.f32 %v2853_v44, 0.0 }
 0x7ed   : > { %v2856_v47 = vmax.f32 %v2848_v46, 0.0 }
 0x7ef   : > { %3514 = vmatprep.mubr.msk.f32.mxu1 %vm2864_vm4, %v2856_v47 }
 0x7f0   : > { %3515 = vmatmul.mubr.msk.f32.vlgmr.msra.gmra.mrb[24].mxu1 %vm2864_vm4, %v2857_v48 }
 0x8c3   : > { %v3516_v50 = vpop.f32.mrb[24].mxu1 }
 0x8c4   : > { %v2943_v24 = vadd.f32 %v3516_v50, %v3270_v49  ;;  %v2937_v51 = vpop.f32.mrb[25].mxu1 }
 0x8c5   : > { %v2938_v21 = vadd.f32 %v3270_v49, %v2937_v51 }
 0x8c6   : > { %v2949_v52 = vadd.f32 %v2943_v24, %v2754_v39 }
 0x8c7   : > { %v2948_v53 = vadd.f32 %v2938_v21, %v2753_v35 }
 0x8c8   : > { %v2953_v54 = vsel %vm695_vm1, %v2949_v52, 0.0 }
 0x8c9   : > { %2954 = vadd.xlane.f32.xlu0 %v2953_v54  ;;  %v2950_v55 = vsel %vm695_vm1, %v2948_v53, 0.0 }
 0x8ca   : > { %2951 = vadd.xlane.f32.xlu1 %v2950_v55 }
 0x956   : > { %v2955_v56 = vpop.xlane.xlu0 %2954 }
 0x957   : > { %v2957_v57 = vmul.f32 0.03125, %v2955_v56  ;;  %v2952_v58 = vpop.xlane.xlu1 %2951 }
 0x958   : > { %v2956_v59 = vmul.f32 0.03125, %v2952_v58 }
 0x959   : > { %v2959_v60 = vsub.f32 %v2949_v52, %v2957_v57 }
 0x95a   : > { %v2958_v61 = vsub.f32 %v2948_v53, %v2956_v59 }
 0x95b   : > { %v2961_v7 = vmul.f32 %v2959_v60, %v2959_v60 }
 0x95c   : > { %v2960_v62 = vmul.f32 %v2958_v61, %v2958_v61 }
 0x95d   : > { %v2965_v63 = vsel %vm695_vm1, %v2961_v7, 0.0 }
 0x95e   : > { %2966 = vadd.xlane.f32.xlu0 %v2965_v63  ;;  %v2962_v0 = vsel %vm695_vm1, %v2960_v62, 0.0 }
 0x95f   : > { %2963 = vadd.xlane.f32.xlu1 %v2962_v0 }
 0x9eb   : > { %v2967_v1 = vpop.xlane.xlu0 %2966 }
 0x9ec   : > { %v2969_v2 = vmul.f32 0.03125, %v2967_v1  ;;  %v2964_v9 = vpop.xlane.xlu1 %2963 }
 0x9ed   : > { %v2968_v3 = vmul.f32 0.03125, %v2964_v9 }
 0x9ee   : > { %v2971_v4 = vadd.f32 1e-05, %v2969_v2 }
 0x9ef   : > { %v2970_v5 = vadd.f32 1e-05, %v2968_v3 }
 0x9f0   : > { %3622 = vrsqrt.f32 %v2971_v4 }
 0x9f1   : > { %3624 = vrsqrt.f32 %v2970_v5 }
 0x9fa   : > { %v3623_v6 = vpop.eup %3622 }
 0x9fb   : > { %v3625_v10 = vpop.eup %3624  ;;  %v2975_v11 = vmul.f32 %v3623_v6, %v2959_v60 }
 0x9fc   : > { %v2974_v14 = vmul.f32 %v3625_v10, %v2958_v61  ;;  %2997 = sbr.rel (%p3275_p4) target bundleno = 2888 (0xb48), region = 92 }
 0x9fd   : > { %v2983_v15 = vmul.f32 %v3273_v8, %v2975_v11 }
 0x9fe   : > { %v2982_v16 = vmul.f32 %v3273_v8, %v2974_v14 }
 0x9ff   : > { %v2991_v17 = vadd.f32 %v3274_v13, %v2983_v15 }
 0xa00   : > { %v2990_v18 = vadd.f32 %v3274_v13, %v2982_v16 }
 0xa01   : > { %2993 = vst.msk [vmem:[#allocation5 + $0x8] sm:$0xff] %vm695_vm1, %v2991_v17 }
 0xa02   : > { %2992 = vst.msk [vmem:[#allocation5] sm:$0xff] %vm695_vm1, %v2990_v18 }
 0xa08   : > { %v2999_v20 = vld [vmem:[#allocation5 + $0x8] sm:$0xff] }
 0xa09   : > { %v2998_v19 = vld [vmem:[#allocation5] sm:$0xff]  ;;  %v3005_v23 = vsel %vm695_vm1, %v2999_v20, 0.0 }
 0xa0a   : > { %v3002_v22 = vsel %vm695_vm1, %v2998_v19, 0.0 }
 0xa0b   : > { %3003 = vadd.xlane.f32.xlu0 %v3002_v22 }
 0xa0f   : > { %3006 = vadd.xlane.f32.xlu0 %v3005_v23 }
 0xa98   : > { %v3004_v25 = vpop.xlane.xlu0 %3003 }
 0xa99   : > { %v3008_v26 = vmul.f32 0.03125, %v3004_v25 }
 0xa9b   : > { %v3010_v27 = vsub.f32 %v2998_v19, %v3008_v26 }
 0xa9c   : > { %v3007_v28 = vpop.xlane.xlu0 %3006 }
 0xa9d   : > { %v3009_v29 = vmul.f32 0.03125, %v3007_v28  ;;  %v3012_v30 = vmul.f32 %v3010_v27, %v3010_v27 }
 0xa9f   : > { %v3011_v31 = vsub.f32 %v2999_v20, %v3009_v29  ;;  %v3014_v32 = vsel %vm695_vm1, %v3012_v30, 0.0 }
 0xaa0   : > { %3015 = vadd.xlane.f32.xlu1 %v3014_v32 }
 0xaa1   : > { %v3013_v33 = vmul.f32 %v3011_v31, %v3011_v31 }
 0xaa3   : > { %v3017_v34 = vsel %vm695_vm1, %v3013_v33, 0.0 }
 0xaa4   : > { %3018 = vadd.xlane.f32.xlu1 %v3017_v34 }
 0xb2d   : > { %v3016_v35 = vpop.xlane.xlu1 %3015 }
 0xb2e   : > { %v3020_v36 = vmul.f32 0.03125, %v3016_v35 }
 0xb30   : > { %v3022_v37 = vadd.f32 1e-05, %v3020_v36 }
 0xb31   : > { %v3019_v38 = vpop.xlane.xlu1 %3018 }
 0xb32   : > { %3626 = vrsqrt.f32 %v3022_v37  ;;  %v3021_v39 = vmul.f32 0.03125, %v3019_v38 }
 0xb34   : > { %v3023_v40 = vadd.f32 1e-05, %v3021_v39 }
 0xb36   : > { %3628 = vrsqrt.f32 %v3023_v40 }
 0xb3c   : > { %v3627_v41 = vpop.eup %3626 }
 0xb3d   : > { %v3026_v12 = vmul.f32 %v3627_v41, %v3010_v27 }
 0xb3f   : > { %v3034_v44 = vmul.f32 %v3276_v42, %v3026_v12 }
 0xb40   : > { %v3629_v45 = vpop.eup %3628 }
 0xb41   : > { %v3042_v46 = vadd.f32 %v3277_v43, %v3034_v44  ;;  %v3027_v47 = vmul.f32 %v3629_v45, %v3011_v31 }
 0xb43   : > { %3044 = vst.msk [vmem:[#allocation5] sm:$0xff] %vm695_vm1, %v3042_v46  ;;  %v3035_v48 = vmul.f32 %v3276_v42, %v3027_v47 }
 0xb45   : > { %v3043_v49 = vadd.f32 %v3277_v43, %v3035_v48 }
 0xb47   : > { %3045 = vst.msk [vmem:[#allocation5 + $0x8] sm:$0xff] %vm695_vm1, %v3043_v49 }
 0xb48 PF: > { %p3563_p6 = scmp.eq.s32.totalorder %s3799_s19, 1  ;;  %s3710_s21 = smov [#allocation5]  }
 0xb49   : > { %s3052_s22 = sshll.u32 %s3710_s21, 4  ;;  %s3053_s22 = int_to_ptr.vmem [resolvable:$true] %s3052_s22 }
 0xb4a   : > { %s3658_s14 = scalar_lea.vmem %s3053_s22, 256  ;;  %p3665_p13 = scmp.lt.s32.totalorder %s3053_s22, %s3053_s22 }
 0xb4b   : > { %p3659_p10 = scmp.ne.s32.totalorder %s3053_s22, %s3658_s14  ;;  %p3666_p0 = scmp.lt.s32.totalorder %s3658_s14, %s3658_s14 }
 0xb4d   : > { %p3660_p11 = pnand %p3659_p10, %p3563_p6  ;;  %p3667_p1 = por %p3666_p0, %p3665_p13 }
 0xb4f   : > { %p3661_p12 = pneg %p3660_p11 }
 0xb51   : > { %p3668_p5 = pnand %p3667_p1, %p3661_p12 }
 0xb53   : > { %3671 = shalt.err (!%p3668_p5)
}
 0xb54   : > { %s4241_s0 = sld [smem:[#allocation15_spill]] }
 0xb5a   : > { %s3672_s15 = scalar_lea.hbm %s4241_s0, 256 }
 0xb5b   : > { %p3673_p7 = scmp.ne.s32.totalorder %s4241_s0, %s3672_s15  ;;  %p3678_p2 = scmp.lt.u32.totalorder %s3672_s15, %s4241_s0 }
 0xb5d   : > { %p3674_p9 = pnand %p3673_p7, %p3563_p6 }
 0xb5f   : > { %p3675_p8 = pneg %p3674_p9 }
 0xb61   : > { %p3680_p3 = pnand %p3678_p2, %p3675_p8 }
 0xb63   : > { %3683 = shalt.err (!%p3680_p3)
}
 0xb64   : > { %s3711_s16 = smov 128   ;;  %s3712_s24 = smov 8  }
 0xb65   : > { %3554 = dma.vmem_to_hbm [thread:$0]  (%p3563_p6), %s3053_s22, 256, %s4241_s0, [#allocation4], %s3711_s16, %s3711_s16, %s3712_s24  }
 0xb66   : > { %3693 = dma.done.wait (%p3563_p6), [#allocation4], 256  }
 0xb67   : > { %3695 = vsyncadd (%p3563_p6), [#allocation4], 4294967040 }
 0xb68 PF: > { %s4242_s26 = sld [smem:[#allocation8_spill]] }
 0xb6e   : > { %s27_s18 = sadd.s32 1, %s4242_s26  }
 0xb6f   : > { %p24_p4 = scmp.ge.s32.totalorder %s27_s18, 4  }
 0xb71   :  { %26 = sbr.rel (!%p24_p4) target bundleno = 10 (0xa), region = 153 }
 0xb78   :  { %3068 = vsyncpa [#allocation3], 1 }
 0xb79   :  { %3070 = vsyncpa [#allocation3 + $0x1], 1 }
 0xb7a   :  { %3071 = vsyncpa [#allocation4], 1 }
 0xb7b   :  { %3073 = vsyncpa [#allocation4 + $0x1], 1 }

</bundles_post_ra>
